<compile_context>
chip_gen: v5e
topology: v5e:2x2
jax: 0.10.0
libtpu: 0.0.40
codegen_flags: <defaults>
</compile_context>

<pallas_src>
import functools

import numpy as np

import jax
import jax.numpy as jnp
from jax.experimental import pallas as pl
from jax.experimental.pallas import tpu as pltpu


def _round_up(x, m):
    return (x + m - 1) // m * m


@functools.lru_cache(maxsize=None)
def _vmem_capacity_bytes():
    """Per-TensorCore VMEM capacity (v5e/v6e: 128 MiB, v7x: 64 MiB)."""
    try:
        info = pltpu.get_tpu_info()
        cap = int(getattr(info, "vmem_capacity_bytes", 0) or 0)
        if cap > 0:
            return cap
    except Exception:
        pass
    return 64 * 1024 * 1024   # conservative fallback == v7x per-TC size


@functools.lru_cache(maxsize=None)
def _probe_roll_mode():
    """Detect pltpu.roll's lane-rotation convention with a tiny one-off kernel.

    Returns +1 if pltpu.roll(x, s, 1)[..., u] == x[..., (u - s) % n]  (jnp.roll),
            -1 if it equals x[..., (u + s) % n],
             0 if pltpu.roll is unusable (kernel falls back to jnp.roll).
    """
    try:
        def _k(x_ref, o_ref):
            o_ref[...] = pltpu.roll(x_ref[...], 5, 1)

        x = np.broadcast_to(np.arange(256, dtype=np.float32), (8, 256))
        y = np.asarray(
            pl.pallas_call(
                _k, out_shape=jax.ShapeDtypeStruct((8, 256), jnp.float32)
            )(jnp.asarray(x))
        )
        if np.array_equal(y, np.roll(x, 5, axis=1)):
            return 1
        if np.array_equal(y, np.roll(x, -5, axis=1)):
            return -1
    except Exception:
        pass
    return 0


def _lane_roll(x, delta, roll_mode):
    """out[..., u] = x[..., (u - delta) % n]   (jnp.roll-by-delta semantics)."""
    n = x.shape[-1]
    if roll_mode == 1:
        return pltpu.roll(x, delta % n, 1)
    if roll_mode == -1:
        return pltpu.roll(x, (-delta) % n, 1)
    return jnp.roll(x, delta, axis=-1)    # slice + concatenate fallback


def _aol_kernel(a_ref, at_ref, mask_ref, qf_ref, out_ref, t_ref, *,
                shifts, d, roll_mode, cdtype, precision):
    j = pl.program_id(2)

    @pl.when(j == 0)
    def _init():
        t_ref[...] = jnp.zeros_like(t_ref)

    a_i = a_ref[0]                        # (Ti, Dp)  resident output-row tile
    a_ic = a_i.astype(cdtype)             # compute copy (bf16 if prep_dtype set)
    a_jt = at_ref[0]                      # (Dp, Tj)  streamed, MXU-native RHS

    acc = jnp.zeros((a_ic.shape[0], 1), dtype=jnp.float32)
    # Static unroll over the (2kh-1)(2kw-1) spatial shifts.  For very large
    # spatial kernels (5x5 / 7x7) this loop should be chunked to bound live
    # ranges; for the 3x3 kernels this module targets a full unroll is fine.
    for s, delta in enumerate(shifts):
        if delta == 0:
            # identity shift: mask is all-ones and the lane-pad columns of A /
            # A^T are zero already, so skip the mask multiply and the roll.
            lhs = a_ic
        else:
            xm = a_ic * mask_ref[s:s + 1, :]        # zero invalid source positions
            lhs = _lane_roll(xm, delta, roll_mode)  # XLU lane rotation
        g = jax.lax.dot_general(                    # (Ti, Tj) gram tile
            lhs, a_jt,
            dimension_numbers=(((1,), (0,)), ((), ())),
            preferred_element_type=jnp.float32,
            precision=precision,
        )
        acc = acc + jnp.sum(jnp.abs(g), axis=1, keepdims=True)
    t_ref[...] = t_ref[...] + acc

    @pl.when(j == pl.num_programs(2) - 1)
    def _finalize():
        t = t_ref[...] * qf_ref[0]                  # per-row exp(q)*exp(-q) factor
        scale = jnp.where(t > 0.0, jax.lax.rsqrt(t), jnp.zeros_like(t))
        out_ref[0] = (a_i[:, :d].astype(jnp.float32) * scale).astype(out_ref.dtype)


def _axis_tiles(n, align, cap=None):
    """Tile candidates (descending) for an axis of extent n that satisfy the
    Mosaic block constraint: multiples of `align`, or the full extent."""
    cands = {n}
    t = align
    while t < n:
        if n % t == 0:
            cands.add(t)
        t += align
    out = sorted(cands, reverse=True)
    if cap is not None:
        capped = [t for t in out if t <= cap]
        if capped:
            out = capped
    return out


def _select_tiles(*, cog, dp, d, s_total, itemsize, budget, groups, ti_cap, tj_cap):
    ti_cands = _axis_tiles(cog, 8, ti_cap)      # sublane axis: multiple of 8 / full
    tj_cands = _axis_tiles(cog, 128, tj_cap)    # lane axis: multiple of 128 / full
    if groups == 1:
        # v7x has two TensorCores; keep >= 2 blocks on the parallel (i) axis so
        # the "parallel" grid dims can be sharded across both cores.
        halves = [t for t in ti_cands if t <= cog // 2]
        if halves:
            ti_cands = halves

    def need(ti, tj):
        blk = (2 * ti * dp          # resident i rows (double-buffered)
               + 2 * dp * tj        # streamed j columns
               + 2 * ti * d         # output tile
               + 2 * s_total * dp   # shift masks
               + 3 * ti * dp)       # roll / mask temporaries
        return blk * itemsize + 3 * ti * tj * 4

    # The per-shift roll+mask prep runs on the i tile, so its cost relative to the
    # MXU work scales as 1/Tj: pick the largest Tj first, then the largest Ti.
    for tj in tj_cands:
        for ti in ti_cands:
            if need(ti, tj) <= budget:
                return ti, tj, need(ti, tj)
    ti, tj = ti_cands[-1], tj_cands[-1]
    return ti, tj, need(ti, tj)


@functools.partial(
    jax.jit,
    static_argnames=("groups", "ti_cap", "tj_cap", "prep_dtype", "precision",
                     "roll_mode", "vmem_cap"))
def _aol_reparametrize_impl(kernel, q, *, groups, ti_cap, tj_cap, prep_dtype,
                            precision, roll_mode, vmem_cap):
    c_out, cig, kh, kw = kernel.shape
    assert c_out % groups == 0, "c_out must be divisible by groups"
    cog = c_out // groups
    khkw = kh * kw
    d = cig * khkw
    dp = _round_up(d, 128)                        # lane-aligned flat width
    s_total = (2 * kh - 1) * (2 * kw - 1)
    cdtype = np.dtype(kernel.dtype) if prep_dtype is None else np.dtype(prep_dtype)

    # ---- layout glue (O(|K|) XLA ops outside the kernel) ----------------------
    a = kernel.reshape(groups, cog, d)
    a = jnp.pad(a, ((0, 0), (0, 0), (0, dp - d)))           # (groups, cog, Dp)
    a_t = jnp.transpose(a, (0, 2, 1)).astype(cdtype)        # (groups, Dp, cog) RHS
    # exp(-q) and exp(q) both broadcast on the output-row axis of ktk: fold the
    # per-row scalar at trace time instead of computing it per grid step.
    qf = (jnp.exp(q) * jnp.exp(-q)).reshape(groups, cog, 1).astype(jnp.float32)

    # per-shift flat deltas + validity masks (trace-time numpy constants)
    yy = np.arange(khkw) // kw
    xx = np.arange(khkw) % kw
    shifts, rows = [], []
    for ey in range(-(kh - 1), kh):
        for ex in range(-(kw - 1), kw):
            shifts.append(int(ey * kw + ex))
            valid = ((yy + ey >= 0) & (yy + ey < kh) &
                     (xx + ex >= 0) & (xx + ex < kw))
            rows.append(np.pad(np.tile(valid, cig), (0, dp - d)))
    shifts = tuple(shifts)
    mask = jnp.asarray(np.stack(rows), dtype=cdtype)         # (S, Dp)

    # ---- tiling / VMEM budget --------------------------------------------------
    itemsize = kernel.dtype.itemsize
    budget = max(8 * 2**20, vmem_cap * 11 // 20)             # ~55% of VMEM
    ti, tj, need_bytes = _select_tiles(
        cog=cog, dp=dp, d=d, s_total=s_total, itemsize=itemsize, budget=budget,
        groups=groups, ti_cap=ti_cap, tj_cap=tj_cap)
    n_i, n_j = cog // ti, cog // tj
    vmem_limit = int(min(vmem_cap * 4 // 5, max(32 * 2**20, need_bytes + 16 * 2**20)))

    cost = pl.CostEstimate(
        flops=2 * groups * cog * cog * s_total * dp,
        transcendentals=c_out,
        bytes_accessed=(a.size + n_i * a_t.size + mask.size + c_out * d) * itemsize
        + qf.size * 4,
    )

    kern = functools.partial(_aol_kernel, shifts=shifts, d=d, roll_mode=roll_mode,
                             cdtype=cdtype, precision=precision)

    out_flat = pl.pallas_call(
        kern,
        out_shape=jax.ShapeDtypeStruct((groups, cog, d), kernel.dtype),
        grid_spec=pltpu.PrefetchScalarGridSpec(
            num_scalar_prefetch=0,
            grid=(groups, n_i, n_j),
            in_specs=[
                pl.BlockSpec((1, ti, dp), lambda g, i, j: (g, i, 0)),   # A, i rows
                pl.BlockSpec((1, dp, tj), lambda g, i, j: (g, 0, j)),   # A^T, j cols
                pl.BlockSpec((s_total, dp), lambda g, i, j: (0, 0)),    # shift masks
                pl.BlockSpec((1, ti, 1), lambda g, i, j: (g, i, 0)),    # q factor
            ],
            out_specs=pl.BlockSpec((1, ti, d), lambda g, i, j: (g, i, 0)),
            scratch_shapes=[pltpu.VMEM((ti, 1), jnp.float32)],
        ),
        compiler_params=pltpu.CompilerParams(
            dimension_semantics=("parallel", "parallel", "arbitrary"),
            vmem_limit_bytes=vmem_limit,
        ),
        cost_estimate=cost,
    )(a, a_t, mask, qf)

    return out_flat.reshape(c_out, cig, kh, kw)


def aol_reparametrize(kernel, q, groups, *, ti_cap=None, tj_cap=None,
                      prep_dtype=None, precision=None):
    """AOLReparametrizer.forward: kernel * safe_inv(sqrt(t)).

    prep_dtype: optional compute dtype (e.g. jnp.bfloat16) for the per-shift
      roll/mask prep and MXU inputs (v6e/v7x lever); None keeps the input dtype.
    precision: lax.Precision for the gram matmuls (None = default MXU path;
      pass HIGH/HIGHEST if the exact Lipschitz bound matters).
    """
    return _aol_reparametrize_impl(
        kernel, q, groups=groups, ti_cap=ti_cap, tj_cap=tj_cap,
        prep_dtype=prep_dtype, precision=precision,
        roll_mode=_probe_roll_mode(), vmem_cap=_vmem_capacity_bytes())


def _reference(kernel, q, groups):
    """Pure-JAX transcription of the PyTorch forward (for verification)."""
    c_out, cig, kh, kw = kernel.shape
    cog = c_out // groups
    c_in = cig * groups
    # transpose_kernel(kernel, groups, flip=True)
    kt = kernel[:, :, ::-1, ::-1]
    kt = kt.reshape(groups, cog, cig, kh, kw)
    kt = jnp.transpose(kt, (0, 2, 1, 3, 4)).reshape(c_in, cog, kh, kw)
    # fast_matrix_conv(kt, kernel, groups)
    m1 = jnp.transpose(kt, (1, 0, 2, 3))            # (cog, c_in, kh, kw)
    m2 = kernel[:, :, ::-1, ::-1]                   # (c_out, cig, kh, kw)
    r2 = jax.lax.conv_general_dilated(
        m1, m2, window_strides=(1, 1),
        padding=((kh - 1, kh - 1), (kw - 1, kw - 1)),
        dimension_numbers=("NCHW", "OIHW", "NCHW"),
        feature_group_count=groups,
        precision=jax.lax.Precision.HIGHEST,
    )
    ktk = jnp.abs(jnp.transpose(r2, (1, 0, 2, 3)))  # (c_out, cog, 2kh-1, 2kw-1)
    qe = jnp.exp(q)
    qi = jnp.exp(-q)
    t = (qi * ktk * qe).sum((1, 2, 3))
    sq = jnp.sqrt(t)
    t = jnp.where(sq == 0.0, 0.0, 1.0 / sq).reshape(-1, 1, 1, 1)
    return kernel * t


def _check(kernel, q, groups, **kw):
    out = jax.block_until_ready(aol_reparametrize(kernel, q, groups, **kw))
    ref = _reference(kernel, q, groups)
    assert out.shape == kernel.shape and out.dtype == kernel.dtype
    err = float(jnp.max(jnp.abs(out - ref)))
    # default-precision MXU matmul in-kernel vs HIGHEST-precision reference
    assert jnp.allclose(out, ref, rtol=1e-2, atol=1e-4), (
        "mismatch vs reference: max abs err = %e" % err
    )


if __name__ == "__main__":
    key = jax.random.PRNGKey(0)
    k1, k2, k3 = jax.random.split(key, 3)

    # case 1: grouped conv weight (groups=2), full-extent tiles within each group
    g1 = 2
    kernel1 = jax.random.normal(k1, (8, 8 // g1, 3, 3), dtype=jnp.float32)
    q1 = jnp.ones((8, 1, 1, 1), dtype=jnp.float32)     # matches nn.Parameter(ones)
    _check(kernel1, q1, g1)

    # case 2: groups=1, c_out=256 with tile caps -> grid (1, 4, 2): exercises the
    # accumulate-over-j reduction path and the >=2 parallel i-blocks rule (v7x).
    kernel2 = jax.random.normal(k2, (256, 8, 3, 3), dtype=jnp.float32)
    q2 = jnp.ones((256, 1, 1, 1), dtype=jnp.float32)
    _check(kernel2, q2, 1, ti_cap=64, tj_cap=128)

    # case 3: non-square spatial kernel (5x3) -> 45 shifts with asymmetric masks
    kernel3 = jax.random.normal(k3, (8, 4, 5, 3), dtype=jnp.float32)
    q3 = jnp.ones((8, 1, 1, 1), dtype=jnp.float32)
    _check(kernel3, q3, 1)

    print("KERNEL_OK")
</pallas_src>

<mosaic_0001>
module attributes {stable_mosaic.version = 11 : i64} {
  func.func @_k(%arg0: memref<8x256xf32, #tpu.memory_space<vmem>>, %arg1: memref<8x256xf32, #tpu.memory_space<vmem>>) attributes {dimension_semantics = [], scalar_prefetch = 0 : i64, scratch_operands = 0 : i64, tpu.core_type = #tpu.core_type<tc>} {
    %c0 = arith.constant 0 : index
    %c0_0 = arith.constant 0 : index
    %0 = vector.load %arg0[%c0, %c0_0] : memref<8x256xf32, #tpu.memory_space<vmem>>, vector<8x256xf32>
    %c5_i32 = arith.constant 5 : i32
    %1 = tpu.dynamic_rotate %0 by %c5_i32 dim 1 : vector<8x256xf32>, i32 -> vector<8x256xf32>
    %c0_1 = arith.constant 0 : index
    %c0_2 = arith.constant 0 : index
    %2 = vector.load %arg1[%c0_1, %c0_2] : memref<8x256xf32, #tpu.memory_space<vmem>>, vector<8x256xf32>
    tpu.vector_store %arg1[%c0_1, %c0_2], %1 {strides = array<i32>} : memref<8x256xf32, #tpu.memory_space<vmem>>, vector<8x256xf32>,
    return
  }
}

module attributes {stable_mosaic.version = 11 : i64} {
  func.func @_aol_kernel(%arg0: i32, %arg1: i32, %arg2: i32, %arg3: memref<1x4x128xf32, #tpu.memory_space<vmem>>, %arg4: memref<1x128x4xf32, #tpu.memory_space<vmem>>, %arg5: memref<25x128xf32, #tpu.memory_space<vmem>>, %arg6: memref<1x4x1xf32, #tpu.memory_space<vmem>>, %arg7: memref<1x4x36xf32, #tpu.memory_space<vmem>>, %arg8: memref<4x1xf32, #tpu.memory_space<vmem>>) attributes {dimension_semantics = [#tpu.dimension_semantics<parallel>, #tpu.dimension_semantics<parallel>, #tpu.dimension_semantics<arbitrary>], iteration_bounds = array<i64: 2, 1, 1>, scalar_prefetch = 0 : i64, scratch_operands = 1 : i64, tpu.core_type = #tpu.core_type<tc>, window_params = [{transform_indices = @transform_0, window_bounds = array<i64: 1, 4, 128>}, {transform_indices = @transform_1, window_bounds = array<i64: 1, 128, 4>}, {pipeline_mode = #tpu.pipeline_mode<synchronous>, transform_indices = @transform_2, window_bounds = array<i64: 25, 128>}, {transform_indices = @transform_3, window_bounds = array<i64: 1, 4, 1>}, {transform_indices = @transform_4, window_bounds = array<i64: 1, 4, 36>}]} {
    %c0_i32 = arith.constant 0 : i32
    %0 = arith.cmpi eq, %arg2, %c0_i32 : i32
    %1 = arith.extui %0 : i1 to i32
    %c0_i32_0 = arith.constant 0 : i32
    %2 = arith.cmpi ne, %1, %c0_i32_0 : i32
    scf.if %2 {
      %cst_87 = arith.constant 0.000000e+00 : f32
      %283 = vector.broadcast %cst_87 : f32 to vector<4x1xf32>
      %c0_88 = arith.constant 0 : index
      %c0_89 = arith.constant 0 : index
      %284 = vector.load %arg8[%c0_88, %c0_89] : memref<4x1xf32, #tpu.memory_space<vmem>>, vector<4x1xf32>
      tpu.vector_store %arg8[%c0_88, %c0_89], %283 {strides = array<i32>} : memref<4x1xf32, #tpu.memory_space<vmem>>, vector<4x1xf32>,
    } else {
    }
    %c0 = arith.constant 0 : index
    %c0_1 = arith.constant 0 : index
    %c0_2 = arith.constant 0 : index
    %3 = vector.load %arg3[%c0, %c0_1, %c0_2] : memref<1x4x128xf32, #tpu.memory_space<vmem>>, vector<1x4x128xf32>
    %4 = vector.shape_cast %3 : vector<1x4x128xf32> to vector<4x128xf32>
    %c0_3 = arith.constant 0 : index
    %c0_4 = arith.constant 0 : index
    %c0_5 = arith.constant 0 : index
    %5 = vector.load %arg4[%c0_3, %c0_4, %c0_5] : memref<1x128x4xf32, #tpu.memory_space<vmem>>, vector<1x128x4xf32>
    %6 = vector.shape_cast %5 : vector<1x128x4xf32> to vector<128x4xf32>
    %cst = arith.constant 0.000000e+00 : f32
    %7 = vector.broadcast %cst : f32 to vector<4x1xf32>
    %c0_6 = arith.constant 0 : index
    %c0_7 = arith.constant 0 : index
    %8 = vector.load %arg5[%c0_6, %c0_7] : memref<25x128xf32, #tpu.memory_space<vmem>>, vector<1x128xf32>
    %9 = vector.broadcast %8 : vector<1x128xf32> to vector<4x128xf32>
    %10 = arith.mulf %4, %9 : vector<4x128xf32>
    %11 = vector.extract_strided_slice %10 {offsets = [0, 8], sizes = [4, 120], strides = [1, 1]} : vector<4x128xf32> to vector<4x120xf32>
    %12 = vector.extract_strided_slice %10 {offsets = [0, 0], sizes = [4, 8], strides = [1, 1]} : vector<4x128xf32> to vector<4x8xf32>
    %13 = tpu.concatenate %11, %12 in 1 : vector<4x120xf32>, vector<4x8xf32> -> vector<4x128xf32>
    %cst_8 = arith.constant dense<0.000000e+00> : vector<4x4xf32>
    %14 = tpu.matmul %13, %6, %cst_8 {dimension_numbers = #tpu.dot_dimension_numbers<[1], [0], [0], [1], [0, 0, 1, 1], [], []>} : vector<4x128xf32>, vector<128x4xf32>, vector<4x4xf32> -> vector<4x4xf32>
    %15 = math.absf %14 : vector<4x4xf32>
    %cst_9 = arith.constant dense<0.000000e+00> : vector<4xf32>
    %16 = vector.multi_reduction <add>, %15, %cst_9 [1] : vector<4x4xf32> to vector<4xf32>
    %17 = vector.shape_cast %16 : vector<4xf32> to vector<4x1xf32>
    %18 = arith.addf %7, %17 : vector<4x1xf32>
    %c1 = arith.constant 1 : index
    %c0_10 = arith.constant 0 : index
    %19 = vector.load %arg5[%c1, %c0_10] : memref<25x128xf32, #tpu.memory_space<vmem>>, vector<1x128xf32>
    %20 = vector.broadcast %19 : vector<1x128xf32> to vector<4x128xf32>
    %21 = arith.mulf %4, %20 : vector<4x128xf32>
    %22 = vector.extract_strided_slice %21 {offsets = [0, 7], sizes = [4, 121], strides = [1, 1]} : vector<4x128xf32> to vector<4x121xf32>
    %23 = vector.extract_strided_slice %21 {offsets = [0, 0], sizes = [4, 7], strides = [1, 1]} : vector<4x128xf32> to vector<4x7xf32>
    %24 = tpu.concatenate %22, %23 in 1 : vector<4x121xf32>, vector<4x7xf32> -> vector<4x128xf32>
    %cst_11 = arith.constant dense<0.000000e+00> : vector<4x4xf32>
    %25 = tpu.matmul %24, %6, %cst_11 {dimension_numbers = #tpu.dot_dimension_numbers<[1], [0], [0], [1], [0, 0, 1, 1], [], []>} : vector<4x128xf32>, vector<128x4xf32>, vector<4x4xf32> -> vector<4x4xf32>
    %26 = math.absf %25 : vector<4x4xf32>
    %cst_12 = arith.constant dense<0.000000e+00> : vector<4xf32>
    %27 = vector.multi_reduction <add>, %26, %cst_12 [1] : vector<4x4xf32> to vector<4xf32>
    %28 = vector.shape_cast %27 : vector<4xf32> to vector<4x1xf32>
    %29 = arith.addf %18, %28 : vector<4x1xf32>
    %c2 = arith.constant 2 : index
    %c0_13 = arith.constant 0 : index
    %30 = vector.load %arg5[%c2, %c0_13] : memref<25x128xf32, #tpu.memory_space<vmem>>, vector<1x128xf32>
    %31 = vector.broadcast %30 : vector<1x128xf32> to vector<4x128xf32>
    %32 = arith.mulf %4, %31 : vector<4x128xf32>
    %33 = vector.extract_strided_slice %32 {offsets = [0, 6], sizes = [4, 122], strides = [1, 1]} : vector<4x128xf32> to vector<4x122xf32>
    %34 = vector.extract_strided_slice %32 {offsets = [0, 0], sizes = [4, 6], strides = [1, 1]} : vector<4x128xf32> to vector<4x6xf32>
    %35 = tpu.concatenate %33, %34 in 1 : vector<4x122xf32>, vector<4x6xf32> -> vector<4x128xf32>
    %cst_14 = arith.constant dense<0.000000e+00> : vector<4x4xf32>
    %36 = tpu.matmul %35, %6, %cst_14 {dimension_numbers = #tpu.dot_dimension_numbers<[1], [0], [0], [1], [0, 0, 1, 1], [], []>} : vector<4x128xf32>, vector<128x4xf32>, vector<4x4xf32> -> vector<4x4xf32>
    %37 = math.absf %36 : vector<4x4xf32>
    %cst_15 = arith.constant dense<0.000000e+00> : vector<4xf32>
    %38 = vector.multi_reduction <add>, %37, %cst_15 [1] : vector<4x4xf32> to vector<4xf32>
    %39 = vector.shape_cast %38 : vector<4xf32> to vector<4x1xf32>
    %40 = arith.addf %29, %39 : vector<4x1xf32>
    %c3 = arith.constant 3 : index
    %c0_16 = arith.constant 0 : index
    %41 = vector.load %arg5[%c3, %c0_16] : memref<25x128xf32, #tpu.memory_space<vmem>>, vector<1x128xf32>
    %42 = vector.broadcast %41 : vector<1x128xf32> to vector<4x128xf32>
    %43 = arith.mulf %4, %42 : vector<4x128xf32>
    %44 = vector.extract_strided_slice %43 {offsets = [0, 5], sizes = [4, 123], strides = [1, 1]} : vector<4x128xf32> to vector<4x123xf32>
    %45 = vector.extract_strided_slice %43 {offsets = [0, 0], sizes = [4, 5], strides = [1, 1]} : vector<4x128xf32> to vector<4x5xf32>
    %46 = tpu.concatenate %44, %45 in 1 : vector<4x123xf32>, vector<4x5xf32> -> vector<4x128xf32>
    %cst_17 = arith.constant dense<0.000000e+00> : vector<4x4xf32>
    %47 = tpu.matmul %46, %6, %cst_17 {dimension_numbers = #tpu.dot_dimension_numbers<[1], [0], [0], [1], [0, 0, 1, 1], [], []>} : vector<4x128xf32>, vector<128x4xf32>, vector<4x4xf32> -> vector<4x4xf32>
    %48 = math.absf %47 : vector<4x4xf32>
    %cst_18 = arith.constant dense<0.000000e+00> : vector<4xf32>
    %49 = vector.multi_reduction <add>, %48, %cst_18 [1] : vector<4x4xf32> to vector<4xf32>
    %50 = vector.shape_cast %49 : vector<4xf32> to vector<4x1xf32>
    %51 = arith.addf %40, %50 : vector<4x1xf32>
    %c4 = arith.constant 4 : index
    %c0_19 = arith.constant 0 : index
    %52 = vector.load %arg5[%c4, %c0_19] : memref<25x128xf32, #tpu.memory_space<vmem>>, vector<1x128xf32>
    %53 = vector.broadcast %52 : vector<1x128xf32> to vector<4x128xf32>
    %54 = arith.mulf %4, %53 : vector<4x128xf32>
    %55 = vector.extract_strided_slice %54 {offsets = [0, 4], sizes = [4, 124], strides = [1, 1]} : vector<4x128xf32> to vector<4x124xf32>
    %56 = vector.extract_strided_slice %54 {offsets = [0, 0], sizes = [4, 4], strides = [1, 1]} : vector<4x128xf32> to vector<4x4xf32>
    %57 = tpu.concatenate %55, %56 in 1 : vector<4x124xf32>, vector<4x4xf32> -> vector<4x128xf32>
    %cst_20 = arith.constant dense<0.000000e+00> : vector<4x4xf32>
    %58 = tpu.matmul %57, %6, %cst_20 {dimension_numbers = #tpu.dot_dimension_numbers<[1], [0], [0], [1], [0, 0, 1, 1], [], []>} : vector<4x128xf32>, vector<128x4xf32>, vector<4x4xf32> -> vector<4x4xf32>
    %59 = math.absf %58 : vector<4x4xf32>
    %cst_21 = arith.constant dense<0.000000e+00> : vector<4xf32>
    %60 = vector.multi_reduction <add>, %59, %cst_21 [1] : vector<4x4xf32> to vector<4xf32>
    %61 = vector.shape_cast %60 : vector<4xf32> to vector<4x1xf32>
    %62 = arith.addf %51, %61 : vector<4x1xf32>
    %c5 = arith.constant 5 : index
    %c0_22 = arith.constant 0 : index
    %63 = vector.load %arg5[%c5, %c0_22] : memref<25x128xf32, #tpu.memory_space<vmem>>, vector<1x128xf32>
    %64 = vector.broadcast %63 : vector<1x128xf32> to vector<4x128xf32>
    %65 = arith.mulf %4, %64 : vector<4x128xf32>
    %66 = vector.extract_strided_slice %65 {offsets = [0, 5], sizes = [4, 123], strides = [1, 1]} : vector<4x128xf32> to vector<4x123xf32>
    %67 = vector.extract_strided_slice %65 {offsets = [0, 0], sizes = [4, 5], strides = [1, 1]} : vector<4x128xf32> to vector<4x5xf32>
    %68 = tpu.concatenate %66, %67 in 1 : vector<4x123xf32>, vector<4x5xf32> -> vector<4x128xf32>
    %cst_23 = arith.constant dense<0.000000e+00> : vector<4x4xf32>
    %69 = tpu.matmul %68, %6, %cst_23 {dimension_numbers = #tpu.dot_dimension_numbers<[1], [0], [0], [1], [0, 0, 1, 1], [], []>} : vector<4x128xf32>, vector<128x4xf32>, vector<4x4xf32> -> vector<4x4xf32>
    %70 = math.absf %69 : vector<4x4xf32>
    %cst_24 = arith.constant dense<0.000000e+00> : vector<4xf32>
    %71 = vector.multi_reduction <add>, %70, %cst_24 [1] : vector<4x4xf32> to vector<4xf32>
    %72 = vector.shape_cast %71 : vector<4xf32> to vector<4x1xf32>
    %73 = arith.addf %62, %72 : vector<4x1xf32>
    %c6 = arith.constant 6 : index
    %c0_25 = arith.constant 0 : index
    %74 = vector.load %arg5[%c6, %c0_25] : memref<25x128xf32, #tpu.memory_space<vmem>>, vector<1x128xf32>
    %75 = vector.broadcast %74 : vector<1x128xf32> to vector<4x128xf32>
    %76 = arith.mulf %4, %75 : vector<4x128xf32>
    %77 = vector.extract_strided_slice %76 {offsets = [0, 4], sizes = [4, 124], strides = [1, 1]} : vector<4x128xf32> to vector<4x124xf32>
    %78 = vector.extract_strided_slice %76 {offsets = [0, 0], sizes = [4, 4], strides = [1, 1]} : vector<4x128xf32> to vector<4x4xf32>
    %79 = tpu.concatenate %77, %78 in 1 : vector<4x124xf32>, vector<4x4xf32> -> vector<4x128xf32>
    %cst_26 = arith.constant dense<0.000000e+00> : vector<4x4xf32>
    %80 = tpu.matmul %79, %6, %cst_26 {dimension_numbers = #tpu.dot_dimension_numbers<[1], [0], [0], [1], [0, 0, 1, 1], [], []>} : vector<4x128xf32>, vector<128x4xf32>, vector<4x4xf32> -> vector<4x4xf32>
    %81 = math.absf %80 : vector<4x4xf32>
    %cst_27 = arith.constant dense<0.000000e+00> : vector<4xf32>
    %82 = vector.multi_reduction <add>, %81, %cst_27 [1] : vector<4x4xf32> to vector<4xf32>
    %83 = vector.shape_cast %82 : vector<4xf32> to vector<4x1xf32>
    %84 = arith.addf %73, %83 : vector<4x1xf32>
    %c7 = arith.constant 7 : index
    %c0_28 = arith.constant 0 : index
    %85 = vector.load %arg5[%c7, %c0_28] : memref<25x128xf32, #tpu.memory_space<vmem>>, vector<1x128xf32>
    %86 = vector.broadcast %85 : vector<1x128xf32> to vector<4x128xf32>
    %87 = arith.mulf %4, %86 : vector<4x128xf32>
    %88 = vector.extract_strided_slice %87 {offsets = [0, 3], sizes = [4, 125], strides = [1, 1]} : vector<4x128xf32> to vector<4x125xf32>
    %89 = vector.extract_strided_slice %87 {offsets = [0, 0], sizes = [4, 3], strides = [1, 1]} : vector<4x128xf32> to vector<4x3xf32>
    %90 = tpu.concatenate %88, %89 in 1 : vector<4x125xf32>, vector<4x3xf32> -> vector<4x128xf32>
    %cst_29 = arith.constant dense<0.000000e+00> : vector<4x4xf32>
    %91 = tpu.matmul %90, %6, %cst_29 {dimension_numbers = #tpu.dot_dimension_numbers<[1], [0], [0], [1], [0, 0, 1, 1], [], []>} : vector<4x128xf32>, vector<128x4xf32>, vector<4x4xf32> -> vector<4x4xf32>
    %92 = math.absf %91 : vector<4x4xf32>
    %cst_30 = arith.constant dense<0.000000e+00> : vector<4xf32>
    %93 = vector.multi_reduction <add>, %92, %cst_30 [1] : vector<4x4xf32> to vector<4xf32>
    %94 = vector.shape_cast %93 : vector<4xf32> to vector<4x1xf32>
    %95 = arith.addf %84, %94 : vector<4x1xf32>
    %c8 = arith.constant 8 : index
    %c0_31 = arith.constant 0 : index
    %96 = vector.load %arg5[%c8, %c0_31] : memref<25x128xf32, #tpu.memory_space<vmem>>, vector<1x128xf32>
    %97 = vector.broadcast %96 : vector<1x128xf32> to vector<4x128xf32>
    %98 = arith.mulf %4, %97 : vector<4x128xf32>
    %99 = vector.extract_strided_slice %98 {offsets = [0, 2], sizes = [4, 126], strides = [1, 1]} : vector<4x128xf32> to vector<4x126xf32>
    %100 = vector.extract_strided_slice %98 {offsets = [0, 0], sizes = [4, 2], strides = [1, 1]} : vector<4x128xf32> to vector<4x2xf32>
    %101 = tpu.concatenate %99, %100 in 1 : vector<4x126xf32>, vector<4x2xf32> -> vector<4x128xf32>
    %cst_32 = arith.constant dense<0.000000e+00> : vector<4x4xf32>
    %102 = tpu.matmul %101, %6, %cst_32 {dimension_numbers = #tpu.dot_dimension_numbers<[1], [0], [0], [1], [0, 0, 1, 1], [], []>} : vector<4x128xf32>, vector<128x4xf32>, vector<4x4xf32> -> vector<4x4xf32>
    %103 = math.absf %102 : vector<4x4xf32>
    %cst_33 = arith.constant dense<0.000000e+00> : vector<4xf32>
    %104 = vector.multi_reduction <add>, %103, %cst_33 [1] : vector<4x4xf32> to vector<4xf32>
    %105 = vector.shape_cast %104 : vector<4xf32> to vector<4x1xf32>
    %106 = arith.addf %95, %105 : vector<4x1xf32>
    %c9 = arith.constant 9 : index
    %c0_34 = arith.constant 0 : index
    %107 = vector.load %arg5[%c9, %c0_34] : memref<25x128xf32, #tpu.memory_space<vmem>>, vector<1x128xf32>
    %108 = vector.broadcast %107 : vector<1x128xf32> to vector<4x128xf32>
    %109 = arith.mulf %4, %108 : vector<4x128xf32>
    %110 = vector.extract_strided_slice %109 {offsets = [0, 1], sizes = [4, 127], strides = [1, 1]} : vector<4x128xf32> to vector<4x127xf32>
    %111 = vector.extract_strided_slice %109 {offsets = [0, 0], sizes = [4, 1], strides = [1, 1]} : vector<4x128xf32> to vector<4x1xf32>
    %112 = tpu.concatenate %110, %111 in 1 : vector<4x127xf32>, vector<4x1xf32> -> vector<4x128xf32>
    %cst_35 = arith.constant dense<0.000000e+00> : vector<4x4xf32>
    %113 = tpu.matmul %112, %6, %cst_35 {dimension_numbers = #tpu.dot_dimension_numbers<[1], [0], [0], [1], [0, 0, 1, 1], [], []>} : vector<4x128xf32>, vector<128x4xf32>, vector<4x4xf32> -> vector<4x4xf32>
    %114 = math.absf %113 : vector<4x4xf32>
    %cst_36 = arith.constant dense<0.000000e+00> : vector<4xf32>
    %115 = vector.multi_reduction <add>, %114, %cst_36 [1] : vector<4x4xf32> to vector<4xf32>
    %116 = vector.shape_cast %115 : vector<4xf32> to vector<4x1xf32>
    %117 = arith.addf %106, %116 : vector<4x1xf32>
    %c10 = arith.constant 10 : index
    %c0_37 = arith.constant 0 : index
    %118 = vector.load %arg5[%c10, %c0_37] : memref<25x128xf32, #tpu.memory_space<vmem>>, vector<1x128xf32>
    %119 = vector.broadcast %118 : vector<1x128xf32> to vector<4x128xf32>
    %120 = arith.mulf %4, %119 : vector<4x128xf32>
    %121 = vector.extract_strided_slice %120 {offsets = [0, 2], sizes = [4, 126], strides = [1, 1]} : vector<4x128xf32> to vector<4x126xf32>
    %122 = vector.extract_strided_slice %120 {offsets = [0, 0], sizes = [4, 2], strides = [1, 1]} : vector<4x128xf32> to vector<4x2xf32>
    %123 = tpu.concatenate %121, %122 in 1 : vector<4x126xf32>, vector<4x2xf32> -> vector<4x128xf32>
    %cst_38 = arith.constant dense<0.000000e+00> : vector<4x4xf32>
    %124 = tpu.matmul %123, %6, %cst_38 {dimension_numbers = #tpu.dot_dimension_numbers<[1], [0], [0], [1], [0, 0, 1, 1], [], []>} : vector<4x128xf32>, vector<128x4xf32>, vector<4x4xf32> -> vector<4x4xf32>
    %125 = math.absf %124 : vector<4x4xf32>
    %cst_39 = arith.constant dense<0.000000e+00> : vector<4xf32>
    %126 = vector.multi_reduction <add>, %125, %cst_39 [1] : vector<4x4xf32> to vector<4xf32>
    %127 = vector.shape_cast %126 : vector<4xf32> to vector<4x1xf32>
    %128 = arith.addf %117, %127 : vector<4x1xf32>
    %c11 = arith.constant 11 : index
    %c0_40 = arith.constant 0 : index
    %129 = vector.load %arg5[%c11, %c0_40] : memref<25x128xf32, #tpu.memory_space<vmem>>, vector<1x128xf32>
    %130 = vector.broadcast %129 : vector<1x128xf32> to vector<4x128xf32>
    %131 = arith.mulf %4, %130 : vector<4x128xf32>
    %132 = vector.extract_strided_slice %131 {offsets = [0, 1], sizes = [4, 127], strides = [1, 1]} : vector<4x128xf32> to vector<4x127xf32>
    %133 = vector.extract_strided_slice %131 {offsets = [0, 0], sizes = [4, 1], strides = [1, 1]} : vector<4x128xf32> to vector<4x1xf32>
    %134 = tpu.concatenate %132, %133 in 1 : vector<4x127xf32>, vector<4x1xf32> -> vector<4x128xf32>
    %cst_41 = arith.constant dense<0.000000e+00> : vector<4x4xf32>
    %135 = tpu.matmul %134, %6, %cst_41 {dimension_numbers = #tpu.dot_dimension_numbers<[1], [0], [0], [1], [0, 0, 1, 1], [], []>} : vector<4x128xf32>, vector<128x4xf32>, vector<4x4xf32> -> vector<4x4xf32>
    %136 = math.absf %135 : vector<4x4xf32>
    %cst_42 = arith.constant dense<0.000000e+00> : vector<4xf32>
    %137 = vector.multi_reduction <add>, %136, %cst_42 [1] : vector<4x4xf32> to vector<4xf32>
    %138 = vector.shape_cast %137 : vector<4xf32> to vector<4x1xf32>
    %139 = arith.addf %128, %138 : vector<4x1xf32>
    %cst_43 = arith.constant dense<0.000000e+00> : vector<4x4xf32>
    %140 = tpu.matmul %4, %6, %cst_43 {dimension_numbers = #tpu.dot_dimension_numbers<[1], [0], [0], [1], [0, 0, 1, 1], [], []>} : vector<4x128xf32>, vector<128x4xf32>, vector<4x4xf32> -> vector<4x4xf32>
    %141 = math.absf %140 : vector<4x4xf32>
    %cst_44 = arith.constant dense<0.000000e+00> : vector<4xf32>
    %142 = vector.multi_reduction <add>, %141, %cst_44 [1] : vector<4x4xf32> to vector<4xf32>
    %143 = vector.shape_cast %142 : vector<4xf32> to vector<4x1xf32>
    %144 = arith.addf %139, %143 : vector<4x1xf32>
    %c13 = arith.constant 13 : index
    %c0_45 = arith.constant 0 : index
    %145 = vector.load %arg5[%c13, %c0_45] : memref<25x128xf32, #tpu.memory_space<vmem>>, vector<1x128xf32>
    %146 = vector.broadcast %145 : vector<1x128xf32> to vector<4x128xf32>
    %147 = arith.mulf %4, %146 : vector<4x128xf32>
    %148 = vector.extract_strided_slice %147 {offsets = [0, 127], sizes = [4, 1], strides = [1, 1]} : vector<4x128xf32> to vector<4x1xf32>
    %149 = vector.extract_strided_slice %147 {offsets = [0, 0], sizes = [4, 127], strides = [1, 1]} : vector<4x128xf32> to vector<4x127xf32>
    %150 = tpu.concatenate %148, %149 in 1 : vector<4x1xf32>, vector<4x127xf32> -> vector<4x128xf32>
    %cst_46 = arith.constant dense<0.000000e+00> : vector<4x4xf32>
    %151 = tpu.matmul %150, %6, %cst_46 {dimension_numbers = #tpu.dot_dimension_numbers<[1], [0], [0], [1], [0, 0, 1, 1], [], []>} : vector<4x128xf32>, vector<128x4xf32>, vector<4x4xf32> -> vector<4x4xf32>
    %152 = math.absf %151 : vector<4x4xf32>
    %cst_47 = arith.constant dense<0.000000e+00> : vector<4xf32>
    %153 = vector.multi_reduction <add>, %152, %cst_47 [1] : vector<4x4xf32> to vector<4xf32>
    %154 = vector.shape_cast %153 : vector<4xf32> to vector<4x1xf32>
    %155 = arith.addf %144, %154 : vector<4x1xf32>
    %c14 = arith.constant 14 : index
    %c0_48 = arith.constant 0 : index
    %156 = vector.load %arg5[%c14, %c0_48] : memref<25x128xf32, #tpu.memory_space<vmem>>, vector<1x128xf32>
    %157 = vector.broadcast %156 : vector<1x128xf32> to vector<4x128xf32>
    %158 = arith.mulf %4, %157 : vector<4x128xf32>
    %159 = vector.extract_strided_slice %158 {offsets = [0, 126], sizes = [4, 2], strides = [1, 1]} : vector<4x128xf32> to vector<4x2xf32>
    %160 = vector.extract_strided_slice %158 {offsets = [0, 0], sizes = [4, 126], strides = [1, 1]} : vector<4x128xf32> to vector<4x126xf32>
    %161 = tpu.concatenate %159, %160 in 1 : vector<4x2xf32>, vector<4x126xf32> -> vector<4x128xf32>
    %cst_49 = arith.constant dense<0.000000e+00> : vector<4x4xf32>
    %162 = tpu.matmul %161, %6, %cst_49 {dimension_numbers = #tpu.dot_dimension_numbers<[1], [0], [0], [1], [0, 0, 1, 1], [], []>} : vector<4x128xf32>, vector<128x4xf32>, vector<4x4xf32> -> vector<4x4xf32>
    %163 = math.absf %162 : vector<4x4xf32>
    %cst_50 = arith.constant dense<0.000000e+00> : vector<4xf32>
    %164 = vector.multi_reduction <add>, %163, %cst_50 [1] : vector<4x4xf32> to vector<4xf32>
    %165 = vector.shape_cast %164 : vector<4xf32> to vector<4x1xf32>
    %166 = arith.addf %155, %165 : vector<4x1xf32>
    %c15 = arith.constant 15 : index
    %c0_51 = arith.constant 0 : index
    %167 = vector.load %arg5[%c15, %c0_51] : memref<25x128xf32, #tpu.memory_space<vmem>>, vector<1x128xf32>
    %168 = vector.broadcast %167 : vector<1x128xf32> to vector<4x128xf32>
    %169 = arith.mulf %4, %168 : vector<4x128xf32>
    %170 = vector.extract_strided_slice %169 {offsets = [0, 127], sizes = [4, 1], strides = [1, 1]} : vector<4x128xf32> to vector<4x1xf32>
    %171 = vector.extract_strided_slice %169 {offsets = [0, 0], sizes = [4, 127], strides = [1, 1]} : vector<4x128xf32> to vector<4x127xf32>
    %172 = tpu.concatenate %170, %171 in 1 : vector<4x1xf32>, vector<4x127xf32> -> vector<4x128xf32>
    %cst_52 = arith.constant dense<0.000000e+00> : vector<4x4xf32>
    %173 = tpu.matmul %172, %6, %cst_52 {dimension_numbers = #tpu.dot_dimension_numbers<[1], [0], [0], [1], [0, 0, 1, 1], [], []>} : vector<4x128xf32>, vector<128x4xf32>, vector<4x4xf32> -> vector<4x4xf32>
    %174 = math.absf %173 : vector<4x4xf32>
    %cst_53 = arith.constant dense<0.000000e+00> : vector<4xf32>
    %175 = vector.multi_reduction <add>, %174, %cst_53 [1] : vector<4x4xf32> to vector<4xf32>
    %176 = vector.shape_cast %175 : vector<4xf32> to vector<4x1xf32>
    %177 = arith.addf %166, %176 : vector<4x1xf32>
    %c16 = arith.constant 16 : index
    %c0_54 = arith.constant 0 : index
    %178 = vector.load %arg5[%c16, %c0_54] : memref<25x128xf32, #tpu.memory_space<vmem>>, vector<1x128xf32>
    %179 = vector.broadcast %178 : vector<1x128xf32> to vector<4x128xf32>
    %180 = arith.mulf %4, %179 : vector<4x128xf32>
    %181 = vector.extract_strided_slice %180 {offsets = [0, 126], sizes = [4, 2], strides = [1, 1]} : vector<4x128xf32> to vector<4x2xf32>
    %182 = vector.extract_strided_slice %180 {offsets = [0, 0], sizes = [4, 126], strides = [1, 1]} : vector<4x128xf32> to vector<4x126xf32>
    %183 = tpu.concatenate %181, %182 in 1 : vector<4x2xf32>, vector<4x126xf32> -> vector<4x128xf32>
    %cst_55 = arith.constant dense<0.000000e+00> : vector<4x4xf32>
    %184 = tpu.matmul %183, %6, %cst_55 {dimension_numbers = #tpu.dot_dimension_numbers<[1], [0], [0], [1], [0, 0, 1, 1], [], []>} : vector<4x128xf32>, vector<128x4xf32>, vector<4x4xf32> -> vector<4x4xf32>
    %185 = math.absf %184 : vector<4x4xf32>
    %cst_56 = arith.constant dense<0.000000e+00> : vector<4xf32>
    %186 = vector.multi_reduction <add>, %185, %cst_56 [1] : vector<4x4xf32> to vector<4xf32>
    %187 = vector.shape_cast %186 : vector<4xf32> to vector<4x1xf32>
    %188 = arith.addf %177, %187 : vector<4x1xf32>
    %c17 = arith.constant 17 : index
    %c0_57 = arith.constant 0 : index
    %189 = vector.load %arg5[%c17, %c0_57] : memref<25x128xf32, #tpu.memory_space<vmem>>, vector<1x128xf32>
    %190 = vector.broadcast %189 : vector<1x128xf32> to vector<4x128xf32>
    %191 = arith.mulf %4, %190 : vector<4x128xf32>
    %192 = vector.extract_strided_slice %191 {offsets = [0, 125], sizes = [4, 3], strides = [1, 1]} : vector<4x128xf32> to vector<4x3xf32>
    %193 = vector.extract_strided_slice %191 {offsets = [0, 0], sizes = [4, 125], strides = [1, 1]} : vector<4x128xf32> to vector<4x125xf32>
    %194 = tpu.concatenate %192, %193 in 1 : vector<4x3xf32>, vector<4x125xf32> -> vector<4x128xf32>
    %cst_58 = arith.constant dense<0.000000e+00> : vector<4x4xf32>
    %195 = tpu.matmul %194, %6, %cst_58 {dimension_numbers = #tpu.dot_dimension_numbers<[1], [0], [0], [1], [0, 0, 1, 1], [], []>} : vector<4x128xf32>, vector<128x4xf32>, vector<4x4xf32> -> vector<4x4xf32>
    %196 = math.absf %195 : vector<4x4xf32>
    %cst_59 = arith.constant dense<0.000000e+00> : vector<4xf32>
    %197 = vector.multi_reduction <add>, %196, %cst_59 [1] : vector<4x4xf32> to vector<4xf32>
    %198 = vector.shape_cast %197 : vector<4xf32> to vector<4x1xf32>
    %199 = arith.addf %188, %198 : vector<4x1xf32>
    %c18 = arith.constant 18 : index
    %c0_60 = arith.constant 0 : index
    %200 = vector.load %arg5[%c18, %c0_60] : memref<25x128xf32, #tpu.memory_space<vmem>>, vector<1x128xf32>
    %201 = vector.broadcast %200 : vector<1x128xf32> to vector<4x128xf32>
    %202 = arith.mulf %4, %201 : vector<4x128xf32>
    %203 = vector.extract_strided_slice %202 {offsets = [0, 124], sizes = [4, 4], strides = [1, 1]} : vector<4x128xf32> to vector<4x4xf32>
    %204 = vector.extract_strided_slice %202 {offsets = [0, 0], sizes = [4, 124], strides = [1, 1]} : vector<4x128xf32> to vector<4x124xf32>
    %205 = tpu.concatenate %203, %204 in 1 : vector<4x4xf32>, vector<4x124xf32> -> vector<4x128xf32>
    %cst_61 = arith.constant dense<0.000000e+00> : vector<4x4xf32>
    %206 = tpu.matmul %205, %6, %cst_61 {dimension_numbers = #tpu.dot_dimension_numbers<[1], [0], [0], [1], [0, 0, 1, 1], [], []>} : vector<4x128xf32>, vector<128x4xf32>, vector<4x4xf32> -> vector<4x4xf32>
    %207 = math.absf %206 : vector<4x4xf32>
    %cst_62 = arith.constant dense<0.000000e+00> : vector<4xf32>
    %208 = vector.multi_reduction <add>, %207, %cst_62 [1] : vector<4x4xf32> to vector<4xf32>
    %209 = vector.shape_cast %208 : vector<4xf32> to vector<4x1xf32>
    %210 = arith.addf %199, %209 : vector<4x1xf32>
    %c19 = arith.constant 19 : index
    %c0_63 = arith.constant 0 : index
    %211 = vector.load %arg5[%c19, %c0_63] : memref<25x128xf32, #tpu.memory_space<vmem>>, vector<1x128xf32>
    %212 = vector.broadcast %211 : vector<1x128xf32> to vector<4x128xf32>
    %213 = arith.mulf %4, %212 : vector<4x128xf32>
    %214 = vector.extract_strided_slice %213 {offsets = [0, 123], sizes = [4, 5], strides = [1, 1]} : vector<4x128xf32> to vector<4x5xf32>
    %215 = vector.extract_strided_slice %213 {offsets = [0, 0], sizes = [4, 123], strides = [1, 1]} : vector<4x128xf32> to vector<4x123xf32>
    %216 = tpu.concatenate %214, %215 in 1 : vector<4x5xf32>, vector<4x123xf32> -> vector<4x128xf32>
    %cst_64 = arith.constant dense<0.000000e+00> : vector<4x4xf32>
    %217 = tpu.matmul %216, %6, %cst_64 {dimension_numbers = #tpu.dot_dimension_numbers<[1], [0], [0], [1], [0, 0, 1, 1], [], []>} : vector<4x128xf32>, vector<128x4xf32>, vector<4x4xf32> -> vector<4x4xf32>
    %218 = math.absf %217 : vector<4x4xf32>
    %cst_65 = arith.constant dense<0.000000e+00> : vector<4xf32>
    %219 = vector.multi_reduction <add>, %218, %cst_65 [1] : vector<4x4xf32> to vector<4xf32>
    %220 = vector.shape_cast %219 : vector<4xf32> to vector<4x1xf32>
    %221 = arith.addf %210, %220 : vector<4x1xf32>
    %c20 = arith.constant 20 : index
    %c0_66 = arith.constant 0 : index
    %222 = vector.load %arg5[%c20, %c0_66] : memref<25x128xf32, #tpu.memory_space<vmem>>, vector<1x128xf32>
    %223 = vector.broadcast %222 : vector<1x128xf32> to vector<4x128xf32>
    %224 = arith.mulf %4, %223 : vector<4x128xf32>
    %225 = vector.extract_strided_slice %224 {offsets = [0, 124], sizes = [4, 4], strides = [1, 1]} : vector<4x128xf32> to vector<4x4xf32>
    %226 = vector.extract_strided_slice %224 {offsets = [0, 0], sizes = [4, 124], strides = [1, 1]} : vector<4x128xf32> to vector<4x124xf32>
    %227 = tpu.concatenate %225, %226 in 1 : vector<4x4xf32>, vector<4x124xf32> -> vector<4x128xf32>
    %cst_67 = arith.constant dense<0.000000e+00> : vector<4x4xf32>
    %228 = tpu.matmul %227, %6, %cst_67 {dimension_numbers = #tpu.dot_dimension_numbers<[1], [0], [0], [1], [0, 0, 1, 1], [], []>} : vector<4x128xf32>, vector<128x4xf32>, vector<4x4xf32> -> vector<4x4xf32>
    %229 = math.absf %228 : vector<4x4xf32>
    %cst_68 = arith.constant dense<0.000000e+00> : vector<4xf32>
    %230 = vector.multi_reduction <add>, %229, %cst_68 [1] : vector<4x4xf32> to vector<4xf32>
    %231 = vector.shape_cast %230 : vector<4xf32> to vector<4x1xf32>
    %232 = arith.addf %221, %231 : vector<4x1xf32>
    %c21 = arith.constant 21 : index
    %c0_69 = arith.constant 0 : index
    %233 = vector.load %arg5[%c21, %c0_69] : memref<25x128xf32, #tpu.memory_space<vmem>>, vector<1x128xf32>
    %234 = vector.broadcast %233 : vector<1x128xf32> to vector<4x128xf32>
    %235 = arith.mulf %4, %234 : vector<4x128xf32>
    %236 = vector.extract_strided_slice %235 {offsets = [0, 123], sizes = [4, 5], strides = [1, 1]} : vector<4x128xf32> to vector<4x5xf32>
    %237 = vector.extract_strided_slice %235 {offsets = [0, 0], sizes = [4, 123], strides = [1, 1]} : vector<4x128xf32> to vector<4x123xf32>
    %238 = tpu.concatenate %236, %237 in 1 : vector<4x5xf32>, vector<4x123xf32> -> vector<4x128xf32>
    %cst_70 = arith.constant dense<0.000000e+00> : vector<4x4xf32>
    %239 = tpu.matmul %238, %6, %cst_70 {dimension_numbers = #tpu.dot_dimension_numbers<[1], [0], [0], [1], [0, 0, 1, 1], [], []>} : vector<4x128xf32>, vector<128x4xf32>, vector<4x4xf32> -> vector<4x4xf32>
    %240 = math.absf %239 : vector<4x4xf32>
    %cst_71 = arith.constant dense<0.000000e+00> : vector<4xf32>
    %241 = vector.multi_reduction <add>, %240, %cst_71 [1] : vector<4x4xf32> to vector<4xf32>
    %242 = vector.shape_cast %241 : vector<4xf32> to vector<4x1xf32>
    %243 = arith.addf %232, %242 : vector<4x1xf32>
    %c22 = arith.constant 22 : index
    %c0_72 = arith.constant 0 : index
    %244 = vector.load %arg5[%c22, %c0_72] : memref<25x128xf32, #tpu.memory_space<vmem>>, vector<1x128xf32>
    %245 = vector.broadcast %244 : vector<1x128xf32> to vector<4x128xf32>
    %246 = arith.mulf %4, %245 : vector<4x128xf32>
    %247 = vector.extract_strided_slice %246 {offsets = [0, 122], sizes = [4, 6], strides = [1, 1]} : vector<4x128xf32> to vector<4x6xf32>
    %248 = vector.extract_strided_slice %246 {offsets = [0, 0], sizes = [4, 122], strides = [1, 1]} : vector<4x128xf32> to vector<4x122xf32>
    %249 = tpu.concatenate %247, %248 in 1 : vector<4x6xf32>, vector<4x122xf32> -> vector<4x128xf32>
    %cst_73 = arith.constant dense<0.000000e+00> : vector<4x4xf32>
    %250 = tpu.matmul %249, %6, %cst_73 {dimension_numbers = #tpu.dot_dimension_numbers<[1], [0], [0], [1], [0, 0, 1, 1], [], []>} : vector<4x128xf32>, vector<128x4xf32>, vector<4x4xf32> -> vector<4x4xf32>
    %251 = math.absf %250 : vector<4x4xf32>
    %cst_74 = arith.constant dense<0.000000e+00> : vector<4xf32>
    %252 = vector.multi_reduction <add>, %251, %cst_74 [1] : vector<4x4xf32> to vector<4xf32>
    %253 = vector.shape_cast %252 : vector<4xf32> to vector<4x1xf32>
    %254 = arith.addf %243, %253 : vector<4x1xf32>
    %c23 = arith.constant 23 : index
    %c0_75 = arith.constant 0 : index
    %255 = vector.load %arg5[%c23, %c0_75] : memref<25x128xf32, #tpu.memory_space<vmem>>, vector<1x128xf32>
    %256 = vector.broadcast %255 : vector<1x128xf32> to vector<4x128xf32>
    %257 = arith.mulf %4, %256 : vector<4x128xf32>
    %258 = vector.extract_strided_slice %257 {offsets = [0, 121], sizes = [4, 7], strides = [1, 1]} : vector<4x128xf32> to vector<4x7xf32>
    %259 = vector.extract_strided_slice %257 {offsets = [0, 0], sizes = [4, 121], strides = [1, 1]} : vector<4x128xf32> to vector<4x121xf32>
    %260 = tpu.concatenate %258, %259 in 1 : vector<4x7xf32>, vector<4x121xf32> -> vector<4x128xf32>
    %cst_76 = arith.constant dense<0.000000e+00> : vector<4x4xf32>
    %261 = tpu.matmul %260, %6, %cst_76 {dimension_numbers = #tpu.dot_dimension_numbers<[1], [0], [0], [1], [0, 0, 1, 1], [], []>} : vector<4x128xf32>, vector<128x4xf32>, vector<4x4xf32> -> vector<4x4xf32>
    %262 = math.absf %261 : vector<4x4xf32>
    %cst_77 = arith.constant dense<0.000000e+00> : vector<4xf32>
    %263 = vector.multi_reduction <add>, %262, %cst_77 [1] : vector<4x4xf32> to vector<4xf32>
    %264 = vector.shape_cast %263 : vector<4xf32> to vector<4x1xf32>
    %265 = arith.addf %254, %264 : vector<4x1xf32>
    %c24 = arith.constant 24 : index
    %c0_78 = arith.constant 0 : index
    %266 = vector.load %arg5[%c24, %c0_78] : memref<25x128xf32, #tpu.memory_space<vmem>>, vector<1x128xf32>
    %267 = vector.broadcast %266 : vector<1x128xf32> to vector<4x128xf32>
    %268 = arith.mulf %4, %267 : vector<4x128xf32>
    %269 = vector.extract_strided_slice %268 {offsets = [0, 120], sizes = [4, 8], strides = [1, 1]} : vector<4x128xf32> to vector<4x8xf32>
    %270 = vector.extract_strided_slice %268 {offsets = [0, 0], sizes = [4, 120], strides = [1, 1]} : vector<4x128xf32> to vector<4x120xf32>
    %271 = tpu.concatenate %269, %270 in 1 : vector<4x8xf32>, vector<4x120xf32> -> vector<4x128xf32>
    %cst_79 = arith.constant dense<0.000000e+00> : vector<4x4xf32>
    %272 = tpu.matmul %271, %6, %cst_79 {dimension_numbers = #tpu.dot_dimension_numbers<[1], [0], [0], [1], [0, 0, 1, 1], [], []>} : vector<4x128xf32>, vector<128x4xf32>, vector<4x4xf32> -> vector<4x4xf32>
    %273 = math.absf %272 : vector<4x4xf32>
    %cst_80 = arith.constant dense<0.000000e+00> : vector<4xf32>
    %274 = vector.multi_reduction <add>, %273, %cst_80 [1] : vector<4x4xf32> to vector<4xf32>
    %275 = vector.shape_cast %274 : vector<4xf32> to vector<4x1xf32>
    %276 = arith.addf %265, %275 : vector<4x1xf32>
    %c0_81 = arith.constant 0 : index
    %c0_82 = arith.constant 0 : index
    %277 = vector.load %arg8[%c0_81, %c0_82] : memref<4x1xf32, #tpu.memory_space<vmem>>, vector<4x1xf32>
    %278 = arith.addf %277, %276 : vector<4x1xf32>
    %c0_83 = arith.constant 0 : index
    %c0_84 = arith.constant 0 : index
    %279 = vector.load %arg8[%c0_83, %c0_84] : memref<4x1xf32, #tpu.memory_space<vmem>>, vector<4x1xf32>
    tpu.vector_store %arg8[%c0_83, %c0_84], %278 {strides = array<i32>} : memref<4x1xf32, #tpu.memory_space<vmem>>, vector<4x1xf32>,
    %c0_i32_85 = arith.constant 0 : i32
    %280 = arith.cmpi eq, %arg2, %c0_i32_85 : i32
    %281 = arith.extui %280 : i1 to i32
    %c0_i32_86 = arith.constant 0 : i32
    %282 = arith.cmpi ne, %281, %c0_i32_86 : i32
    scf.if %282 {
      %c0_87 = arith.constant 0 : index
      %c0_88 = arith.constant 0 : index
      %283 = vector.load %arg8[%c0_87, %c0_88] : memref<4x1xf32, #tpu.memory_space<vmem>>, vector<4x1xf32>
      %c0_89 = arith.constant 0 : index
      %c0_90 = arith.constant 0 : index
      %c0_91 = arith.constant 0 : index
      %284 = vector.load %arg6[%c0_89, %c0_90, %c0_91] : memref<1x4x1xf32, #tpu.memory_space<vmem>>, vector<1x4x1xf32>
      %285 = vector.shape_cast %284 : vector<1x4x1xf32> to vector<4x1xf32>
      %286 = arith.mulf %283, %285 : vector<4x1xf32>
      %cst_92 = arith.constant 0.000000e+00 : f32
      %287 = vector.broadcast %cst_92 : f32 to vector<4x1xf32>
      %288 = arith.cmpf ogt, %286, %287 : vector<4x1xf32>
      %289 = math.rsqrt %286 : vector<4x1xf32>
      %cst_93 = arith.constant 0.000000e+00 : f32
      %290 = vector.broadcast %cst_93 : f32 to vector<4x1xf32>
      %291 = arith.select %288, %289, %290 : vector<4x1xi1>, vector<4x1xf32>
      %292 = vector.extract_strided_slice %4 {offsets = [0, 0], sizes = [4, 36], strides = [1, 1]} : vector<4x128xf32> to vector<4x36xf32>
      %293 = vector.broadcast %291 : vector<4x1xf32> to vector<4x36xf32>
      %294 = arith.mulf %292, %293 : vector<4x36xf32>
      %c0_94 = arith.constant 0 : index
      %c0_95 = arith.constant 0 : index
      %c0_96 = arith.constant 0 : index
      %295 = vector.load %arg7[%c0_94, %c0_95, %c0_96] : memref<1x4x36xf32, #tpu.memory_space<vmem>>, vector<1x4x36xf32>
      %296 = vector.shape_cast %295 : vector<1x4x36xf32> to vector<4x36xf32>
      %297 = vector.shape_cast %294 : vector<4x36xf32> to vector<1x4x36xf32>
      tpu.vector_store %arg7[%c0_94, %c0_95, %c0_96], %297 {strides = array<i32>} : memref<1x4x36xf32, #tpu.memory_space<vmem>>, vector<1x4x36xf32>,
    } else {
    }
    return
  }
  func.func @transform_0(%arg0: i32, %arg1: i32, %arg2: i32) -> (i32, i32, i32) {
    %c0_i32 = arith.constant 0 : i32
    %c0_i32_0 = arith.constant 0 : i32
    return %arg0, %arg1, %c0_i32 : i32, i32, i32
  }
  func.func @transform_1(%arg0: i32, %arg1: i32, %arg2: i32) -> (i32, i32, i32) {
    %c0_i32 = arith.constant 0 : i32
    %c0_i32_0 = arith.constant 0 : i32
    return %arg0, %c0_i32, %arg2 : i32, i32, i32
  }
  func.func @transform_2(%arg0: i32, %arg1: i32, %arg2: i32) -> (i32, i32) {
    %c0_i32 = arith.constant 0 : i32
    %c0_i32_0 = arith.constant 0 : i32
    %c0_i32_1 = arith.constant 0 : i32
    return %c0_i32, %c0_i32_0 : i32, i32
  }
  func.func @transform_3(%arg0: i32, %arg1: i32, %arg2: i32) -> (i32, i32, i32) {
    %c0_i32 = arith.constant 0 : i32
    %c0_i32_0 = arith.constant 0 : i32
    return %arg0, %arg1, %c0_i32 : i32, i32, i32
  }
  func.func @transform_4(%arg0: i32, %arg1: i32, %arg2: i32) -> (i32, i32, i32) {
    %c0_i32 = arith.constant 0 : i32
    %c0_i32_0 = arith.constant 0 : i32
    return %arg0, %arg1, %c0_i32 : i32, i32, i32
  }
}

</mosaic_0001>

<bundles_post_ra>
// kernel: tpu_custom_call.1
= control target key start
LH: loop header
LB: loop body
LE: loop exit
PB: predicated region body
PF: predicated region fallthrough
CT: control target
= control target key end

     0   :  { %6 = vsyncpa [#allocation3], 0  ;;  %s127_s0 = inlined_call_operand.hbm [shape: f32[8,256], index: 0, kind: input, shape index: {}]   ;;  %s128_s1 = inlined_call_operand.hbm [shape: f32[8,256], index: 1, kind: output, shape index: {}]  }
   0x1   :  { %7 = vsyncpa [#allocation4], 0  ;;  %s13_s8 = sshll.u32 %s127_s0, 4  ;;  %s108_s9 = smov [#allocation2]   ;;  %s14_s8 = int_to_ptr.hbm [resolvable:$true] %s13_s8 }
   0x2   :  { %s15_s10 = sshll.u32 %s108_s9, 4  ;;  %s16_s10 = int_to_ptr.vmem [resolvable:$true] %s15_s10 }
   0x3   :  { %18 = dma.hbm_to_vmem [thread:$0]  %s14_s8, 256, %s16_s10, [#allocation3]  }
   0x4   :  { %104 = dma.done.wait [#allocation3], 256  }
   0x5   :  { %105 = vsyncadd [#allocation3], 4294967040  ;;  %v23_v0 = vld [vmem:[#allocation2] sm:$0xff]  ;;  %s109_s11 = smov 5   ;;  %v24_v1 = vld [vmem:[#allocation2 + $0x8] sm:$0xff]  ;;  %v29_v2 = vlaneseq  ;;  %s110_s12 = smov [#allocation5]  }
   0x6   :  { %25 = vrot.lane.b32.xlu0 %v23_v0, %s109_s11  ;;  %s41_s13 = sshll.u32 %s110_s12, 4  ;;  %s43_s15 = sshll.u32 %s128_s1, 4  ;;  %s42_s13 = int_to_ptr.vmem [resolvable:$true] %s41_s13  ;;  %s44_s15 = int_to_ptr.hbm [resolvable:$true] %s43_s15 }
   0x7   :  { %v30_v4 = vand.u32 127, %v29_v2 }
   0x9   :  { %vm31_vm0 = vcmp.lt.s32.totalorder %v30_v4, 5 }
   0xe   :  { %27 = vrot.lane.b32.xlu0 %v24_v1, %s109_s11 }
  0x78   :  { %v26_v3 = vpop.permute.xlu0 %25 }
  0x80   :  { %v28_v5 = vpop.permute.xlu0 %27 }
  0x81   :  { %v32_v6 = vsel %vm31_vm0, %v26_v3, %v28_v5  ;;  %v33_v7 = vsel %vm31_vm0, %v28_v5, %v26_v3 }
  0x82   :  { %34 = vst [vmem:[#allocation5] sm:$0xff] %v33_v7 }
  0x83   :  { %35 = vst [vmem:[#allocation5 + $0x8] sm:$0xff] %v32_v6 }
  0x84   :  { %46 = dma.vmem_to_hbm [thread:$0]  %s42_s13, 256, %s44_s15, [#allocation4]  }
  0x85   :  { %106 = dma.done.wait [#allocation4], 256  }
  0x86   :  { %107 = vsyncadd [#allocation4], 4294967040 }
  0x87   :  { %51 = vsyncpa [#allocation3], 1 }
  0x88   :  { %52 = vsyncpa [#allocation4], 1 }

// kernel: _aol_reparametrize_impl.1
= control target key start
LH: loop header
LB: loop body
LE: loop exit
PB: predicated region body
PF: predicated region fallthrough
CT: control target
= control target key end

     0   :  { %s1429_s15 = smov 0   ;;  %s1431_s16 = smov 0   ;;  %s2059_s0 = inlined_call_operand.vmem [shape: f32[2,4,128], index: 0, kind: input, shape index: {}]   ;;  %s2060_s1 = inlined_call_operand.vmem [shape: f32[2,128,4], index: 1, kind: input, shape index: {}]   ;;  %s2061_s2 = inlined_call_operand.vmem [shape: f32[25,128], index: 2, kind: input, shape index: {}]   ;;  %s2062_s3 = inlined_call_operand.vmem [shape: f32[2,4,1], index: 3, kind: input, shape index: {}]   ;;  %s2063_s4 = inlined_call_operand.vmem [shape: f32[2,4,36], index: 4, kind: output, shape index: {}]  }
   0x1   :  { %s1433_s17 = smov 0  }
   0x2 LB: > { %s33_s18 = sadd.s32 1, %s1380_s16  ;;  %p1251_p0 = scmp.ge.s32.totalorder %s1384_s17, 1  ;;  %s1384_s17 = sphi %s1433_s17, %s14_s17   ;;  %s1380_s16 = sphi %s1431_s16, %s2065_s16   ;;  %s1376_s15 = sphi %s1429_s15, %s2064_s15  }
   0x3   : > { %p35_p1 = scmp.ge.s32.totalorder %s33_s18, 2  ;;  %p216_p2 = scmp.lt.s32.totalorder %s1384_s17, 3 }
   0x5   : > { %s2067_s18 = smov (%p35_p1, %s33_s18), 0  ;;  %p217_p3 = pnand %p1251_p0, %p216_p2 }
   0x6   : > { %p261_p4 = scmp.lt.s32.totalorder (!%p217_p3), %s1376_s15, 1  ;;  %s1386_s20 = smov (!%p217_p3), 121  }
   0x7   : > { %220 = sbr.rel (%p217_p3) target bundleno = 689 (0x2b1), region = 36  ;;  %s1387_s21 = smov (!%p217_p3), 120  }
   0x8   : > { %s1388_s22 = smov (!%p217_p3), 122   ;;  %s1389_s5 = smov (!%p217_p3), 124  }
   0x9   : > { %s1390_s6 = smov (!%p217_p3), 125   ;;  %s1391_s9 = smov (!%p217_p3), 123  }
   0xa   : > { %s1393_s19 = smov (!%p217_p3), 127   ;;  %s1394_s25 = smov (!%p217_p3), 1  }
   0xb   : > { %s1395_s26 = smov (!%p217_p3), 2   ;;  %s1397_s7 = smov (!%p217_p3), 3  }
   0xc   : > { %v1328_v0 = vld [vmem:[%s2061_s2 + $0x1] ss:$0 sm:$0xff]  ;;  %s2069_s15 = smov (!%p261_p4, %s1376_s15), 1  ;;  %v1329_v1 = vld [vmem:[%s2061_s2] ss:$0 sm:$0xff]  ;;  %s1398_s11 = smov 4  }
   0xd   : > { %s1453_s23 = sshll.u32 %s2069_s15, 2  ;;  %s1259_s24 = sshll.u32 %s2069_s15, 7  ;;  %v1332_v2 = vld [vmem:[%s2061_s2 + $0x2] ss:$0 sm:$0xff]  ;;  %v1330_v3 = vld [vmem:[%s2061_s2 + $0x4] ss:$0 sm:$0xff] }
   0xe   : > { %s1462_s29 = scalar_lea.vmem %s2059_s0, %s1453_s23  ;;  %v1331_v4 = vld [vmem:[%s2061_s2 + $0x6] ss:$0 sm:$0xff]  ;;  %s1473_s10 = scalar_lea.vmem %s2060_s1, %s1259_s24  ;;  %v1334_v6 = vld [vmem:[%s2061_s2 + $0x3] ss:$0 sm:$0xff]  ;;  %v1335_v9 = vld [vmem:[%s2061_s2 + $0x5] ss:$0 sm:$0xff] }
   0xf   : > { %v1476_v5 = vld [vmem:[%s1462_s29] sm:$0xf]  ;;  %v1333_v11 = vld [vmem:[%s2061_s2 + $0x7] ss:$0 sm:$0xff]  ;;  %v1493_v14 = vld [vmem:[%s1473_s10 + $0x78] sm:$0xff]  ;;  %s1392_s15 = smov 126   ;;  %s289_s8 = scalar_lea.vmem %s2063_s4, %s1453_s23 }
  0x10   : > { %v348_v7 = vmul.f32 %v1328_v0, %v1476_v5  ;;  %v315_v8 = vmul.f32 %v1329_v1, %v1476_v5  ;;  %v380_v10 = vmul.f32 %v1332_v2, %v1476_v5  ;;  %v444_v12 = vmul.f32 %v1330_v3, %v1476_v5  ;;  %v1496_v15 = vld [vmem:[%s1473_s10 + $0x70] sm:$0xff]  ;;  %385 = vmatpush.msra.mxu2 %v1493_v14  ;;  %v1504_v18 = vld [vmem:[%s1473_s10 + $0x68] sm:$0xff]  ;;  %v1512_v21 = vld [vmem:[%s1473_s10 + $0x60] sm:$0xff]  ;;  %s1401_s28 = smov 8  }
  0x11   : > { %v508_v13 = vmul.f32 %v1331_v4, %v1476_v5  ;;  %v412_v16 = vmul.f32 %v1334_v6, %v1476_v5  ;;  %v476_v17 = vmul.f32 %v1335_v9, %v1476_v5  ;;  %320 = vmatpush.msra.mxu0 %v1493_v14  ;;  %353 = vmatpush.msra.mxu1 %v1493_v14  ;;  %v1338_v23 = vld [vmem:[%s2061_s2 + $0x9] ss:$0 sm:$0xff]  ;;  %v1339_v24 = vld [vmem:[%s2061_s2 + $0xb] ss:$0 sm:$0xff]  ;;  %v1336_v25 = vld [vmem:[%s2061_s2 + $0x8] ss:$0 sm:$0xff] }
  0x12   : > { %350 = vrot.lane.b32.xlu1 %v348_v7, %s1386_s20  ;;  %317 = vrot.lane.b32.xlu0 %v315_v8, %s1387_s21  ;;  %v540_v20 = vmul.f32 %v1333_v11, %v1476_v5  ;;  %v1529_v26 = vld [vmem:[%s1473_s10 + $0x58] sm:$0xff]  ;;  %v1337_v27 = vld [vmem:[%s2061_s2 + $0xa] ss:$0 sm:$0xff]  ;;  %v604_v29 = vmul.f32 %v1338_v23, %v1476_v5  ;;  %v668_v30 = vmul.f32 %v1339_v24, %v1476_v5  ;;  %s1399_s21 = smov 6   ;;  %vm341_vm0 = vcmask 27648  }
  0x13   : > { %382 = vrot.lane.b32.xlu2 %v380_v10, %s1388_s22  ;;  %386 = vmatpush.msra.mxu2 %v1496_v15  ;;  %v1307_v19 = vpack.i.bf16 %v508_v13, %v444_v12  ;;  %v1302_v22 = vpack.i.bf16 %v476_v17, %v412_v16  ;;  %v1537_v28 = vld [vmem:[%s1473_s10 + $0x50] sm:$0xff]  ;;  %v1542_v31 = vld [vmem:[%s1473_s10 + $0x48] sm:$0xff]  ;;  %v572_v33 = vmul.f32 %v1336_v25, %v1476_v5  ;;  %v1563_v37 = vld [vmem:[%s1473_s10 + $0x40] sm:$0xff]  ;;  %vm294_vm1 = vcmask 3072  }
  0x14   : > { %417 = vmatpush.msra.mxu3 %v1493_v14  ;;  %321 = vmatpush.msra.mxu0 %v1496_v15  ;;  %v1340_v32 = vld [vmem:[%s2061_s2 + $0xd] ss:$0 sm:$0xff]  ;;  %v636_v34 = vmul.f32 %v1337_v27, %v1476_v5  ;;  %v1341_v35 = vld [vmem:[%s2061_s2 + $0xf] ss:$0 sm:$0xff]  ;;  %v1312_v36 = vpack.i.bf16 %v668_v30, %v604_v29  ;;  %v1570_v40 = vld [vmem:[%s1473_s10 + $0x38] sm:$0xff]  ;;  %vm1135_vm6 = vcmask 289792  }
  0x15   : > { %354 = vmatpush.msra.mxu1 %v1496_v15  ;;  %387 = vmatpush.msra.mxu2 %v1504_v18  ;;  %v725_v38 = vmul.f32 %v1340_v32, %v1476_v5  ;;  %v789_v39 = vmul.f32 %v1341_v35, %v1476_v5  ;;  %v1576_v41 = vld [vmem:[%s1473_s10 + $0x30] sm:$0xff]  ;;  %v1583_v43 = vld [vmem:[%s1473_s10 + $0x28] sm:$0xff]  ;;  %v1590_v44 = vld [vmem:[%s1473_s10 + $0x20] sm:$0xff] }
  0x16   : > { %418 = vmatpush.msra.mxu3 %v1496_v15  ;;  %322 = vmatpush.msra.mxu0 %v1504_v18  ;;  %v1342_v45 = vld [vmem:[%s2061_s2 + $0xe] ss:$0 sm:$0xff]  ;;  %v1343_v46 = vld [vmem:[%s2061_s2 + $0x10] ss:$0 sm:$0xff]  ;;  %v1602_v47 = vld [vmem:[%s1473_s10 + $0x18] sm:$0xff] }
  0x17   : > { %355 = vmatpush.msra.mxu1 %v1504_v18  ;;  %388 = vmatpush.msra.mxu2 %v1512_v21  ;;  %v1322_v42 = vpack.i.bf16 %v725_v38, %v789_v39  ;;  %v1609_v48 = vld [vmem:[%s1473_s10 + $0x10] sm:$0xff]  ;;  %v757_v49 = vmul.f32 %v1342_v45, %v1476_v5  ;;  %v821_v50 = vmul.f32 %v1343_v46, %v1476_v5  ;;  %v1618_v51 = vld [vmem:[%s1473_s10 + $0x8] sm:$0xff]  ;;  %v1625_v52 = vld [vmem:[%s1473_s10] sm:$0xff] }
  0x18   : > { %419 = vmatpush.msra.mxu3 %v1504_v18  ;;  %323 = vmatpush.msra.mxu0 %v1512_v21  ;;  %v1344_v54 = vld [vmem:[%s2061_s2 + $0x13] ss:$0 sm:$0xff]  ;;  %v1345_v55 = vld [vmem:[%s2061_s2 + $0x11] ss:$0 sm:$0xff]  ;;  %v1346_v58 = vld [vmem:[%s2061_s2 + $0x12] ss:$0 sm:$0xff] }
  0x19   : > { %389 = vmatpush.msra.mxu2 %v1529_v26  ;;  %356 = vmatpush.msra.mxu1 %v1512_v21  ;;  %v1317_v53 = vpack.i.bf16 %v821_v50, %v757_v49  ;;  %v917_v56 = vmul.f32 %v1344_v54, %v1476_v5  ;;  %v853_v57 = vmul.f32 %v1345_v55, %v1476_v5  ;;  %v1347_v60 = vld [vmem:[%s2061_s2 + $0x14] ss:$0 sm:$0xff]  ;;  %v1348_v63 = vld [vmem:[%s2061_s2 + $0x15] ss:$0 sm:$0xff]  ;;  %v1349_v3 = vld [vmem:[%s2061_s2 + $0x16] ss:$0 sm:$0xff] }
  0x1a   : > { %1308 = vrot.lane.b32.xlu1 %v1307_v19, %s1389_s5  ;;  %542 = vrot.lane.b32.xlu0 %v540_v20, %s1390_s6  ;;  %s1396_s6 = smov 5   ;;  %v885_v59 = vmul.f32 %v1346_v58, %v1476_v5  ;;  %v949_v61 = vmul.f32 %v1347_v60, %v1476_v5  ;;  %v981_v0 = vmul.f32 %v1348_v63, %v1476_v5  ;;  %v1350_v13 = vld [vmem:[%s2061_s2 + $0x17] ss:$0 sm:$0xff]  ;;  %v1351_v27 = vld [vmem:[%s2061_s2 + $0x18] ss:$0 sm:$0xff]  ;;  %s282_s5 = scalar_lea.vmem %s2062_s3, %s1453_s23 }
  0x1b   : > { %1303 = vrot.lane.b32.xlu2 %v1302_v22, %s1391_s9  ;;  %324 = vmatpush.msra.mxu0 %v1529_v26  ;;  %v1013_v4 = vmul.f32 %v1349_v3, %v1476_v5  ;;  %v1045_v16 = vmul.f32 %v1350_v13, %v1476_v5  ;;  %v1077_v30 = vmul.f32 %v1351_v27, %v1476_v5  ;;  %v1354_v46 = vld [vmem:[%s1473_s10 + $0x78] sm:$0xff]  ;;  %v1355_v54 = vld [vmem:[%s1473_s10 + $0x70] sm:$0xff]  ;;  %v1356_v55 = vld [vmem:[%s1473_s10 + $0x68] sm:$0xff] }
  0x1c   : > { %420 = vmatpush.msra.mxu3 %v1512_v21  ;;  %390 = vmatpush.msra.mxu2 %v1537_v28  ;;  %v1358_v58 = vld [vmem:[%s1473_s10 + $0x58] sm:$0xff]  ;;  %v1360_v63 = vld [vmem:[%s1473_s10 + $0x48] sm:$0xff] }
  0x1d   : > { %357 = vmatpush.msra.mxu1 %v1529_v26  ;;  %325 = vmatpush.msra.mxu0 %v1537_v28 }
  0x1e   : > { %421 = vmatpush.msra.mxu3 %v1529_v26  ;;  %391 = vmatpush.msra.mxu2 %v1542_v31 }
  0x1f   : > { %358 = vmatpush.msra.mxu1 %v1537_v28  ;;  %326 = vmatpush.msra.mxu0 %v1542_v31 }
  0x20   : > { %422 = vmatpush.msra.mxu3 %v1537_v28  ;;  %392 = vmatpush.msra.mxu2 %v1563_v37 }
  0x21   : > { %327 = vmatpush.msra.mxu0 %v1563_v37  ;;  %359 = vmatpush.msra.mxu1 %v1542_v31 }
  0x22   : > { %574 = vrot.lane.b32.xlu0 %v572_v33, %s1392_s15  ;;  %638 = vrot.lane.b32.xlu1 %v636_v34, %s1392_s15 }
  0x23   : > { %1313 = vrot.lane.b32.xlu2 %v1312_v36, %s1393_s19  ;;  %393 = vmatpush.msra.mxu2 %v1570_v40 }
  0x24   : > { %423 = vmatpush.msra.mxu3 %v1542_v31  ;;  %328 = vmatpush.msra.mxu0 %v1570_v40 }
  0x25   : > { %360 = vmatpush.msra.mxu1 %v1563_v37  ;;  %394 = vmatpush.msra.mxu2 %v1576_v41 }
  0x26   : > { %424 = vmatpush.msra.mxu3 %v1563_v37  ;;  %329 = vmatpush.msra.mxu0 %v1576_v41 }
  0x27   : > { %361 = vmatpush.msra.mxu1 %v1570_v40  ;;  %395 = vmatpush.msra.mxu2 %v1583_v43 }
  0x28   : > { %425 = vmatpush.msra.mxu3 %v1570_v40  ;;  %330 = vmatpush.msra.mxu0 %v1583_v43 }
  0x29   : > { %362 = vmatpush.msra.mxu1 %v1576_v41  ;;  %396 = vmatpush.msra.mxu2 %v1590_v44 }
  0x2a   : > { %1323 = vrot.lane.b32.xlu1 %v1322_v42, %s1394_s25  ;;  %426 = vmatpush.msra.mxu3 %v1576_v41  ;;  %s1400_s25 = smov 7  }
  0x2b   : > { %331 = vmatpush.msra.mxu0 %v1590_v44  ;;  %363 = vmatpush.msra.mxu1 %v1583_v43 }
  0x2c   : > { %397 = vmatpush.msra.mxu2 %v1602_v47  ;;  %427 = vmatpush.msra.mxu3 %v1583_v43 }
  0x2d   : > { %332 = vmatpush.msra.mxu0 %v1602_v47  ;;  %364 = vmatpush.msra.mxu1 %v1590_v44 }
  0x2e   : > { %398 = vmatpush.msra.mxu2 %v1609_v48  ;;  %428 = vmatpush.msra.mxu3 %v1590_v44 }
  0x2f   : > { %333 = vmatpush.msra.mxu0 %v1609_v48  ;;  %365 = vmatpush.msra.mxu1 %v1602_v47 }
  0x30   : > { %399 = vmatpush.msra.mxu2 %v1618_v51  ;;  %429 = vmatpush.msra.mxu3 %v1602_v47 }
  0x31   : > { %334 = vmatpush.msra.mxu0 %v1618_v51  ;;  %366 = vmatpush.msra.mxu1 %v1609_v48 }
  0x32   : > { %400 = vmatpush.msra.mxu2 %v1625_v52  ;;  %430 = vmatpush.msra.mxu3 %v1609_v48 }
  0x33   : > { %1318 = vrot.lane.b32.xlu2 %v1317_v53, %s1395_s26  ;;  %335 = vmatpush.msra.mxu0 %v1625_v52 }
  0x34   : > { %513 = vmatpush.msrb.mxu2 %v1493_v14  ;;  %367 = vmatpush.msra.mxu1 %v1618_v51 }
  0x35   : > { %431 = vmatpush.msra.mxu3 %v1618_v51  ;;  %449 = vmatpush.msrb.mxu0 %v1493_v14 }
  0x36   : > { %514 = vmatpush.msrb.mxu2 %v1496_v15  ;;  %368 = vmatpush.msra.mxu1 %v1625_v52 }
  0x37   : > { %432 = vmatpush.msra.mxu3 %v1625_v52  ;;  %450 = vmatpush.msrb.mxu0 %v1496_v15 }
  0x38   : > { %481 = vmatpush.msrb.mxu1 %v1493_v14  ;;  %515 = vmatpush.msrb.mxu2 %v1504_v18 }
  0x39   : > { %545 = vmatpush.msrb.mxu3 %v1493_v14  ;;  %451 = vmatpush.msrb.mxu0 %v1504_v18 }
  0x3a   : > { %482 = vmatpush.msrb.mxu1 %v1496_v15  ;;  %516 = vmatpush.msrb.mxu2 %v1512_v21 }
  0x3b   : > { %546 = vmatpush.msrb.mxu3 %v1496_v15  ;;  %452 = vmatpush.msrb.mxu0 %v1512_v21 }
  0x3c   : > { %483 = vmatpush.msrb.mxu1 %v1504_v18  ;;  %517 = vmatpush.msrb.mxu2 %v1529_v26 }
  0x3d   : > { %547 = vmatpush.msrb.mxu3 %v1504_v18  ;;  %453 = vmatpush.msrb.mxu0 %v1529_v26 }
  0x3e   : > { %484 = vmatpush.msrb.mxu1 %v1512_v21  ;;  %518 = vmatpush.msrb.mxu2 %v1537_v28 }
  0x3f   : > { %548 = vmatpush.msrb.mxu3 %v1512_v21  ;;  %454 = vmatpush.msrb.mxu0 %v1537_v28 }
  0x40   : > { %485 = vmatpush.msrb.mxu1 %v1529_v26  ;;  %519 = vmatpush.msrb.mxu2 %v1542_v31 }
  0x41   : > { %549 = vmatpush.msrb.mxu3 %v1529_v26  ;;  %919 = vrot.lane.b32.xlu1 %v917_v56, %s1396_s6 }
  0x42   : > { %855 = vrot.lane.b32.xlu0 %v853_v57, %s1397_s7  ;;  %455 = vmatpush.msrb.mxu0 %v1542_v31  ;;  %v1357_v57 = vld [vmem:[%s1473_s10 + $0x60] sm:$0xff] }
  0x43   : > { %486 = vmatpush.msrb.mxu1 %v1537_v28  ;;  %520 = vmatpush.msrb.mxu2 %v1563_v37 }
  0x44   : > { %550 = vmatpush.msrb.mxu3 %v1537_v28  ;;  %456 = vmatpush.msrb.mxu0 %v1563_v37 }
  0x45   : > { %487 = vmatpush.msrb.mxu1 %v1542_v31  ;;  %521 = vmatpush.msrb.mxu2 %v1570_v40 }
  0x46   : > { %551 = vmatpush.msrb.mxu3 %v1542_v31  ;;  %457 = vmatpush.msrb.mxu0 %v1570_v40 }
  0x47   : > { %488 = vmatpush.msrb.mxu1 %v1563_v37  ;;  %522 = vmatpush.msrb.mxu2 %v1576_v41 }
  0x48   : > { %552 = vmatpush.msrb.mxu3 %v1563_v37  ;;  %458 = vmatpush.msrb.mxu0 %v1576_v41 }
  0x49   : > { %489 = vmatpush.msrb.mxu1 %v1570_v40  ;;  %523 = vmatpush.msrb.mxu2 %v1583_v43 }
  0x4a   : > { %553 = vmatpush.msrb.mxu3 %v1570_v40  ;;  %459 = vmatpush.msrb.mxu0 %v1583_v43 }
  0x4b   : > { %490 = vmatpush.msrb.mxu1 %v1576_v41  ;;  %524 = vmatpush.msrb.mxu2 %v1590_v44 }
  0x4c   : > { %554 = vmatpush.msrb.mxu3 %v1576_v41  ;;  %460 = vmatpush.msrb.mxu0 %v1590_v44 }
  0x4d   : > { %491 = vmatpush.msrb.mxu1 %v1583_v43  ;;  %525 = vmatpush.msrb.mxu2 %v1602_v47 }
  0x4e   : > { %555 = vmatpush.msrb.mxu3 %v1583_v43  ;;  %461 = vmatpush.msrb.mxu0 %v1602_v47 }
  0x4f   : > { %492 = vmatpush.msrb.mxu1 %v1590_v44  ;;  %526 = vmatpush.msrb.mxu2 %v1609_v48 }
  0x50   : > { %556 = vmatpush.msrb.mxu3 %v1590_v44  ;;  %462 = vmatpush.msrb.mxu0 %v1609_v48 }
  0x51   : > { %493 = vmatpush.msrb.mxu1 %v1602_v47  ;;  %527 = vmatpush.msrb.mxu2 %v1618_v51 }
  0x52   : > { %557 = vmatpush.msrb.mxu3 %v1602_v47  ;;  %463 = vmatpush.msrb.mxu0 %v1618_v51 }
  0x53   : > { %494 = vmatpush.msrb.mxu1 %v1609_v48  ;;  %528 = vmatpush.msrb.mxu2 %v1625_v52 }
  0x54   : > { %558 = vmatpush.msrb.mxu3 %v1609_v48  ;;  %464 = vmatpush.msrb.mxu0 %v1625_v52 }
  0x55   : > { %495 = vmatpush.msrb.mxu1 %v1618_v51  ;;  %887 = vrot.lane.b32.xlu2 %v885_v59, %s1398_s11 }
  0x56   : > { %559 = vmatpush.msrb.mxu3 %v1618_v51  ;;  %951 = vrot.lane.b32.xlu1 %v949_v61, %s1398_s11  ;;  %v1359_v61 = vld [vmem:[%s1473_s10 + $0x50] sm:$0xff] }
  0x57   : > { %496 = vmatpush.msrb.mxu1 %v1625_v52 }
  0x58   : > { %560 = vmatpush.msrb.mxu3 %v1625_v52 }
  0x5d   : > { %1015 = vrot.lane.b32.xlu2 %v1013_v4, %s1399_s21 }
  0x5e   : > { %983 = vrot.lane.b32.xlu1 %v981_v0, %s1396_s6 }
  0x65   : > { %1047 = vrot.lane.b32.xlu2 %v1045_v16, %s1400_s25 }
  0x6d   : > { %v383_v62 = vpop.permute.xlu2 %382  ;;  %1079 = vrot.lane.b32.xlu2 %v1077_v30, %s1401_s28 }
  0x6e   : > { %401 = vmatmul.f32.vlgmr.msra.gmra.mxu2 %v383_v62 }
  0x6f   : > { %641 = vmatpush.msra.mxu2 %v1493_v14 }
  0x71   : > { %642 = vmatpush.msra.mxu2 %v1496_v15 }
  0x73   : > { %643 = vmatpush.msra.mxu2 %v1504_v18 }
  0x75   : > { %v1304_v1 = vpop.permute.xlu2 %1303  ;;  %644 = vmatpush.msra.mxu2 %v1512_v21 }
  0x76   : > { %v1305_v2 = vunpack.i.l.bf16 %v1304_v1  ;;  %v1306_v8 = vunpack.i.h.bf16 %v1304_v1 }
  0x77   : > { %645 = vmatpush.msra.mxu2 %v1529_v26 }
  0x78   : > { %433 = vmatmul.f32.vlgmr.msra.gmra.mxu3 %v1305_v2 }
  0x79   : > { %673 = vmatpush.msra.mxu3 %v1493_v14  ;;  %646 = vmatpush.msra.mxu2 %v1537_v28 }
  0x7b   : > { %674 = vmatpush.msra.mxu3 %v1496_v15  ;;  %647 = vmatpush.msra.mxu2 %v1542_v31 }
  0x7d   : > { %675 = vmatpush.msra.mxu3 %v1504_v18  ;;  %648 = vmatpush.msra.mxu2 %v1563_v37  ;;  %v1314_v17 = vpop.permute.xlu2 %1313 }
  0x7e   : > { %v1315_v20 = vunpack.i.l.bf16 %v1314_v17  ;;  %v1316_v23 = vunpack.i.h.bf16 %v1314_v17 }
  0x7f   : > { %676 = vmatpush.msra.mxu3 %v1512_v21  ;;  %649 = vmatpush.msra.mxu2 %v1570_v40 }
  0x81   : > { %677 = vmatpush.msra.mxu3 %v1529_v26  ;;  %650 = vmatpush.msra.mxu2 %v1576_v41 }
  0x83   : > { %678 = vmatpush.msra.mxu3 %v1537_v28  ;;  %651 = vmatpush.msra.mxu2 %v1583_v43 }
  0x84   : > { %v351_v6 = vpop.permute.xlu1 %350  ;;  %v318_v7 = vpop.permute.xlu0 %317 }
  0x85   : > { %336 = vmatmul.f32.vlgmr.msra.gmra.mxu0 %v318_v7  ;;  %369 = vmatmul.f32.vlgmr.msra.gmra.mxu1 %v351_v6 }
  0x86   : > { %577 = vmatpush.msra.mxu0 %v1493_v14  ;;  %609 = vmatpush.msra.mxu1 %v1493_v14 }
  0x87   : > { %679 = vmatpush.msra.mxu3 %v1542_v31  ;;  %652 = vmatpush.msra.mxu2 %v1590_v44 }
  0x88   : > { %578 = vmatpush.msra.mxu0 %v1496_v15  ;;  %610 = vmatpush.msra.mxu1 %v1496_v15 }
  0x89   : > { %680 = vmatpush.msra.mxu3 %v1563_v37  ;;  %653 = vmatpush.msra.mxu2 %v1602_v47 }
  0x8a   : > { %579 = vmatpush.msra.mxu0 %v1504_v18  ;;  %611 = vmatpush.msra.mxu1 %v1504_v18 }
  0x8b   : > { %681 = vmatpush.msra.mxu3 %v1570_v40  ;;  %654 = vmatpush.msra.mxu2 %v1609_v48 }
  0x8c   : > { %580 = vmatpush.msra.mxu0 %v1512_v21  ;;  %612 = vmatpush.msra.mxu1 %v1512_v21  ;;  %v1309_v9 = vpop.permute.xlu1 %1308  ;;  %v543_v12 = vpop.permute.xlu0 %542 }
  0x8d   : > { %v1311_v10 = vunpack.i.h.bf16 %v1309_v9  ;;  %v1310_v11 = vunpack.i.l.bf16 %v1309_v9  ;;  %682 = vmatpush.msra.mxu3 %v1576_v41  ;;  %497 = vmatmul.f32.vlgmr.msrb.gmra.mxu1 %v1306_v8  ;;  %v1841_v24 = vpop.permute.xlu2 %1318 }
  0x8e   : > { %581 = vmatpush.msra.mxu0 %v1529_v26  ;;  %613 = vmatpush.msra.mxu1 %v1529_v26  ;;  %v1320_v25 = vunpack.i.l.bf16 %v1841_v24  ;;  %v1321_v34 = vunpack.i.h.bf16 %v1841_v24 }
  0x8f   : > { %465 = vmatmul.f32.vlgmr.msrb.gmra.mxu0 %v1310_v11  ;;  %529 = vmatmul.f32.vlgmr.msrb.gmra.mxu2 %v1311_v10 }
  0x90   : > { %582 = vmatpush.msra.mxu0 %v1537_v28  ;;  %614 = vmatpush.msra.mxu1 %v1537_v28 }
  0x91   : > { %561 = vmatmul.f32.vlgmr.msrb.gmra.mxu3 %v543_v12  ;;  %655 = vmatpush.msra.mxu2 %v1618_v51 }
  0x92   : > { %583 = vmatpush.msra.mxu0 %v1542_v31  ;;  %615 = vmatpush.msra.mxu1 %v1542_v31 }
  0x93   : > { %683 = vmatpush.msra.mxu3 %v1583_v43  ;;  %656 = vmatpush.msra.mxu2 %v1625_v52 }
  0x94   : > { %584 = vmatpush.msra.mxu0 %v1563_v37  ;;  %616 = vmatpush.msra.mxu1 %v1563_v37  ;;  %v575_v19 = vpop.permute.xlu0 %574  ;;  %v639_v22 = vpop.permute.xlu1 %638 }
  0x95   : > { %684 = vmatpush.msra.mxu3 %v1590_v44  ;;  %762 = vmatpush.msrb.mxu2 %v1493_v14 }
  0x96   : > { %585 = vmatpush.msra.mxu0 %v1570_v40  ;;  %617 = vmatpush.msra.mxu1 %v1570_v40 }
  0x97   : > { %685 = vmatpush.msra.mxu3 %v1602_v47  ;;  %763 = vmatpush.msrb.mxu2 %v1496_v15 }
  0x98   : > { %586 = vmatpush.msra.mxu0 %v1576_v41  ;;  %618 = vmatpush.msra.mxu1 %v1576_v41 }
  0x99   : > { %686 = vmatpush.msra.mxu3 %v1609_v48  ;;  %764 = vmatpush.msrb.mxu2 %v1504_v18 }
  0x9a   : > { %587 = vmatpush.msra.mxu0 %v1583_v43  ;;  %619 = vmatpush.msra.mxu1 %v1583_v43 }
  0x9b   : > { %687 = vmatpush.msra.mxu3 %v1618_v51  ;;  %765 = vmatpush.msrb.mxu2 %v1512_v21 }
  0x9c   : > { %588 = vmatpush.msra.mxu0 %v1590_v44  ;;  %620 = vmatpush.msra.mxu1 %v1590_v44  ;;  %v1324_v29 = vpop.permute.xlu1 %1323 }
  0x9d   : > { %688 = vmatpush.msra.mxu3 %v1625_v52  ;;  %766 = vmatpush.msrb.mxu2 %v1529_v26  ;;  %v1326_v32 = vunpack.i.h.bf16 %v1324_v29  ;;  %v1325_v33 = vunpack.i.l.bf16 %v1324_v29 }
  0x9e   : > { %589 = vmatpush.msra.mxu0 %v1602_v47  ;;  %621 = vmatpush.msra.mxu1 %v1602_v47 }
  0x9f   : > { %794 = vmatpush.msrb.mxu3 %v1493_v14  ;;  %767 = vmatpush.msrb.mxu2 %v1537_v28 }
  0xa0   : > { %590 = vmatpush.msra.mxu0 %v1609_v48  ;;  %622 = vmatpush.msra.mxu1 %v1609_v48 }
  0xa1   : > { %795 = vmatpush.msrb.mxu3 %v1496_v15  ;;  %768 = vmatpush.msrb.mxu2 %v1542_v31 }
  0xa2   : > { %591 = vmatpush.msra.mxu0 %v1618_v51  ;;  %623 = vmatpush.msra.mxu1 %v1618_v51 }
  0xa3   : > { %796 = vmatpush.msrb.mxu3 %v1504_v18  ;;  %657 = vmatmul.f32.vlgmr.msra.gmra.mxu2 %v639_v22 }
  0xa4   : > { %592 = vmatpush.msra.mxu0 %v1625_v52  ;;  %624 = vmatpush.msra.mxu1 %v1625_v52 }
  0xa5   : > { %593 = vmatmul.f32.vlgmr.msra.gmra.mxu0 %v575_v19  ;;  %797 = vmatpush.msrb.mxu3 %v1512_v21 }
  0xa6   : > { %698 = vmatpush.msrb.mxu0 %v1493_v14  ;;  %730 = vmatpush.msrb.mxu1 %v1493_v14 }
  0xa7   : > { %625 = vmatmul.f32.vlgmr.msra.gmra.mxu1 %v1315_v20  ;;  %798 = vmatpush.msrb.mxu3 %v1529_v26 }
  0xa8   : > { %699 = vmatpush.msrb.mxu0 %v1496_v15  ;;  %731 = vmatpush.msrb.mxu1 %v1496_v15 }
  0xa9   : > { %799 = vmatpush.msrb.mxu3 %v1537_v28  ;;  %769 = vmatpush.msrb.mxu2 %v1563_v37 }
  0xaa   : > { %700 = vmatpush.msrb.mxu0 %v1504_v18  ;;  %732 = vmatpush.msrb.mxu1 %v1504_v18 }
  0xab   : > { %689 = vmatmul.f32.vlgmr.msra.gmra.mxu3 %v1316_v23  ;;  %770 = vmatpush.msrb.mxu2 %v1570_v40 }
  0xac   : > { %701 = vmatpush.msrb.mxu0 %v1512_v21  ;;  %733 = vmatpush.msrb.mxu1 %v1512_v21 }
  0xad   : > { %800 = vmatpush.msrb.mxu3 %v1542_v31  ;;  %771 = vmatpush.msrb.mxu2 %v1576_v41 }
  0xae   : > { %702 = vmatpush.msrb.mxu0 %v1529_v26  ;;  %734 = vmatpush.msrb.mxu1 %v1529_v26 }
  0xaf   : > { %801 = vmatpush.msrb.mxu3 %v1563_v37  ;;  %772 = vmatpush.msrb.mxu2 %v1583_v43 }
  0xb0   : > { %703 = vmatpush.msrb.mxu0 %v1537_v28  ;;  %735 = vmatpush.msrb.mxu1 %v1537_v28 }
  0xb1   : > { %802 = vmatpush.msrb.mxu3 %v1570_v40  ;;  %773 = vmatpush.msrb.mxu2 %v1590_v44 }
  0xb2   : > { %704 = vmatpush.msrb.mxu0 %v1542_v31  ;;  %736 = vmatpush.msrb.mxu1 %v1542_v31 }
  0xb3   : > { %803 = vmatpush.msrb.mxu3 %v1576_v41  ;;  %774 = vmatpush.msrb.mxu2 %v1602_v47  ;;  %v920_v35 = vpop.permute.xlu1 %919 }
  0xb4   : > { %705 = vmatpush.msrb.mxu0 %v1563_v37  ;;  %737 = vmatpush.msrb.mxu1 %v1563_v37  ;;  %v856_v36 = vpop.permute.xlu0 %855 }
  0xb5   : > { %804 = vmatpush.msrb.mxu3 %v1583_v43  ;;  %775 = vmatpush.msrb.mxu2 %v1609_v48 }
  0xb6   : > { %706 = vmatpush.msrb.mxu0 %v1570_v40  ;;  %738 = vmatpush.msrb.mxu1 %v1570_v40 }
  0xb7   : > { %805 = vmatpush.msrb.mxu3 %v1590_v44  ;;  %776 = vmatpush.msrb.mxu2 %v1618_v51 }
  0xb8   : > { %707 = vmatpush.msrb.mxu0 %v1576_v41  ;;  %739 = vmatpush.msrb.mxu1 %v1576_v41 }
  0xb9   : > { %806 = vmatpush.msrb.mxu3 %v1602_v47  ;;  %777 = vmatpush.msrb.mxu2 %v1625_v52 }
  0xba   : > { %708 = vmatpush.msrb.mxu0 %v1583_v43  ;;  %740 = vmatpush.msrb.mxu1 %v1583_v43 }
  0xbb   : > { %807 = vmatpush.msrb.mxu3 %v1609_v48  ;;  %778 = vmatmul.f32.vlgmr.msrb.gmra.mxu2 %v1320_v25 }
  0xbc   : > { %709 = vmatpush.msrb.mxu0 %v1590_v44  ;;  %741 = vmatpush.msrb.mxu1 %v1590_v44 }
  0xbd   : > { %808 = vmatpush.msrb.mxu3 %v1618_v51  ;;  %890 = vmatpush.msra.mxu2 %v1493_v14 }
  0xbe   : > { %710 = vmatpush.msrb.mxu0 %v1602_v47  ;;  %742 = vmatpush.msrb.mxu1 %v1602_v47 }
  0xbf   : > { %809 = vmatpush.msrb.mxu3 %v1625_v52  ;;  %891 = vmatpush.msra.mxu2 %v1496_v15 }
  0xc0   : > { %711 = vmatpush.msrb.mxu0 %v1609_v48  ;;  %743 = vmatpush.msrb.mxu1 %v1609_v48 }
  0xc1   : > { %810 = vmatmul.f32.vlgmr.msrb.gmra.mxu3 %v1325_v33  ;;  %892 = vmatpush.msra.mxu2 %v1504_v18 }
  0xc2   : > { %712 = vmatpush.msrb.mxu0 %v1618_v51  ;;  %744 = vmatpush.msrb.mxu1 %v1618_v51 }
  0xc3   : > { %922 = vmatpush.msra.mxu3 %v1493_v14  ;;  %893 = vmatpush.msra.mxu2 %v1512_v21 }
  0xc4   : > { %713 = vmatpush.msrb.mxu0 %v1625_v52  ;;  %745 = vmatpush.msrb.mxu1 %v1625_v52 }
  0xc5   : > { %714 = vmatmul.f32.vlgmr.msrb.gmra.mxu0 %v1476_v5  ;;  %746 = vmatmul.f32.vlgmr.msrb.gmra.mxu1 %v1326_v32  ;;  %v888_v5 = vpop.permute.xlu2 %887 }
  0xc6   : > { %826 = vmatpush.msra.mxu0 %v1493_v14  ;;  %858 = vmatpush.msra.mxu1 %v1493_v14 }
  0xc7   : > { %923 = vmatpush.msra.mxu3 %v1496_v15  ;;  %894 = vmatpush.msra.mxu2 %v1529_v26 }
  0xc8   : > { %827 = vmatpush.msra.mxu0 %v1496_v15  ;;  %859 = vmatpush.msra.mxu1 %v1496_v15 }
  0xc9   : > { %924 = vmatpush.msra.mxu3 %v1504_v18  ;;  %895 = vmatpush.msra.mxu2 %v1537_v28 }
  0xca   : > { %828 = vmatpush.msra.mxu0 %v1504_v18  ;;  %860 = vmatpush.msra.mxu1 %v1504_v18 }
  0xcb   : > { %925 = vmatpush.msra.mxu3 %v1512_v21  ;;  %896 = vmatpush.msra.mxu2 %v1542_v31 }
  0xcc   : > { %829 = vmatpush.msra.mxu0 %v1512_v21  ;;  %861 = vmatpush.msra.mxu1 %v1512_v21 }
  0xcd   : > { %926 = vmatpush.msra.mxu3 %v1529_v26  ;;  %897 = vmatpush.msra.mxu2 %v1563_v37 }
  0xce   : > { %830 = vmatpush.msra.mxu0 %v1529_v26  ;;  %862 = vmatpush.msra.mxu1 %v1529_v26 }
  0xcf   : > { %927 = vmatpush.msra.mxu3 %v1537_v28  ;;  %898 = vmatpush.msra.mxu2 %v1570_v40 }
  0xd0   : > { %831 = vmatpush.msra.mxu0 %v1537_v28  ;;  %863 = vmatpush.msra.mxu1 %v1537_v28 }
  0xd1   : > { %928 = vmatpush.msra.mxu3 %v1542_v31  ;;  %899 = vmatpush.msra.mxu2 %v1576_v41 }
  0xd2   : > { %832 = vmatpush.msra.mxu0 %v1542_v31  ;;  %864 = vmatpush.msra.mxu1 %v1542_v31 }
  0xd3   : > { %929 = vmatpush.msra.mxu3 %v1563_v37  ;;  %900 = vmatpush.msra.mxu2 %v1583_v43 }
  0xd4   : > { %833 = vmatpush.msra.mxu0 %v1563_v37  ;;  %865 = vmatpush.msra.mxu1 %v1563_v37 }
  0xd5   : > { %930 = vmatpush.msra.mxu3 %v1570_v40  ;;  %901 = vmatpush.msra.mxu2 %v1590_v44 }
  0xd6   : > { %834 = vmatpush.msra.mxu0 %v1570_v40  ;;  %866 = vmatpush.msra.mxu1 %v1570_v40 }
  0xd7   : > { %931 = vmatpush.msra.mxu3 %v1576_v41  ;;  %902 = vmatpush.msra.mxu2 %v1602_v47 }
  0xd8   : > { %835 = vmatpush.msra.mxu0 %v1576_v41  ;;  %867 = vmatpush.msra.mxu1 %v1576_v41 }
  0xd9   : > { %932 = vmatpush.msra.mxu3 %v1583_v43  ;;  %903 = vmatpush.msra.mxu2 %v1609_v48 }
  0xda   : > { %836 = vmatpush.msra.mxu0 %v1583_v43  ;;  %868 = vmatpush.msra.mxu1 %v1583_v43 }
  0xdb   : > { %933 = vmatpush.msra.mxu3 %v1590_v44  ;;  %904 = vmatpush.msra.mxu2 %v1618_v51 }
  0xdc   : > { %837 = vmatpush.msra.mxu0 %v1590_v44  ;;  %869 = vmatpush.msra.mxu1 %v1590_v44 }
  0xdd   : > { %934 = vmatpush.msra.mxu3 %v1602_v47  ;;  %905 = vmatpush.msra.mxu2 %v1625_v52 }
  0xde   : > { %838 = vmatpush.msra.mxu0 %v1602_v47  ;;  %870 = vmatpush.msra.mxu1 %v1602_v47 }
  0xdf   : > { %935 = vmatpush.msra.mxu3 %v1609_v48  ;;  %906 = vmatmul.f32.vlgmr.msra.gmra.mxu2 %v888_v5 }
  0xe0   : > { %839 = vmatpush.msra.mxu0 %v1609_v48  ;;  %871 = vmatpush.msra.mxu1 %v1609_v48 }
  0xe1   : > { %1018 = vmatpush.msrb.mxu2 %v1493_v14  ;;  %936 = vmatpush.msra.mxu3 %v1618_v51 }
  0xe2   : > { %840 = vmatpush.msra.mxu0 %v1618_v51  ;;  %872 = vmatpush.msra.mxu1 %v1618_v51 }
  0xe3   : > { %1019 = vmatpush.msrb.mxu2 %v1496_v15  ;;  %937 = vmatpush.msra.mxu3 %v1625_v52 }
  0xe4   : > { %841 = vmatpush.msra.mxu0 %v1625_v52  ;;  %873 = vmatpush.msra.mxu1 %v1625_v52 }
  0xe5   : > { %842 = vmatmul.f32.vlgmr.msra.gmra.mxu0 %v1321_v34  ;;  %874 = vmatmul.f32.vlgmr.msra.gmra.mxu1 %v856_v36 }
  0xe6   : > { %954 = vmatpush.msrb.mxu0 %v1493_v14  ;;  %938 = vmatmul.f32.vlgmr.msra.gmra.mxu3 %v920_v35 }
  0xe7   : > { %986 = vmatpush.msrb.mxu1 %v1493_v14  ;;  %1020 = vmatpush.msrb.mxu2 %v1504_v18 }
  0xe8   : > { %955 = vmatpush.msrb.mxu0 %v1496_v15  ;;  %1050 = vmatpush.msrb.mxu3 %v1493_v14  ;;  %v952_v14 = vpop.permute.xlu1 %951 }
  0xe9   : > { %987 = vmatpush.msrb.mxu1 %v1496_v15  ;;  %1021 = vmatpush.msrb.mxu2 %v1512_v21 }
  0xea   : > { %956 = vmatpush.msrb.mxu0 %v1504_v18  ;;  %1051 = vmatpush.msrb.mxu3 %v1496_v15  ;;  %v1016_v15 = vpop.permute.xlu2 %1015 }
  0xeb   : > { %988 = vmatpush.msrb.mxu1 %v1504_v18  ;;  %1022 = vmatpush.msrb.mxu2 %v1529_v26 }
  0xec   : > { %957 = vmatpush.msrb.mxu0 %v1512_v21  ;;  %1052 = vmatpush.msrb.mxu3 %v1504_v18 }
  0xed   : > { %989 = vmatpush.msrb.mxu1 %v1512_v21  ;;  %1023 = vmatpush.msrb.mxu2 %v1537_v28 }
  0xee   : > { %958 = vmatpush.msrb.mxu0 %v1529_v26  ;;  %1053 = vmatpush.msrb.mxu3 %v1512_v21 }
  0xef   : > { %990 = vmatpush.msrb.mxu1 %v1529_v26  ;;  %1024 = vmatpush.msrb.mxu2 %v1542_v31 }
  0xf0   : > { %959 = vmatpush.msrb.mxu0 %v1537_v28  ;;  %1054 = vmatpush.msrb.mxu3 %v1529_v26  ;;  %v984_v39 = vpop.permute.xlu1 %983 }
  0xf1   : > { %991 = vmatpush.msrb.mxu1 %v1537_v28  ;;  %1025 = vmatpush.msrb.mxu2 %v1563_v37  ;;  %v402_v18 = vpop.f32.mrf.mxu2 }
  0xf2   : > { %960 = vmatpush.msrb.mxu0 %v1542_v31  ;;  %1055 = vmatpush.msrb.mxu3 %v1537_v28  ;;  %v405_v38 = vand.u32 2147483647, %v402_v18  ;;  %v1048_v45 = vpop.permute.xlu2 %1047 }
  0xf3   : > { %992 = vmatpush.msrb.mxu1 %v1542_v31  ;;  %1026 = vmatpush.msrb.mxu2 %v1570_v40 }
  0xf4   : > { %961 = vmatpush.msrb.mxu0 %v1563_v37  ;;  %1056 = vmatpush.msrb.mxu3 %v1542_v31  ;;  %v406_v50 = vsel %vm341_vm0, %v405_v38, 0.0 }
  0xf5   : > { %993 = vmatpush.msrb.mxu1 %v1563_v37  ;;  %1027 = vmatpush.msrb.mxu2 %v1576_v41 }
  0xf6   : > { %962 = vmatpush.msrb.mxu0 %v1570_v40  ;;  %1057 = vmatpush.msrb.mxu3 %v1563_v37 }
  0xf7   : > { %994 = vmatpush.msrb.mxu1 %v1570_v40  ;;  %1028 = vmatpush.msrb.mxu2 %v1583_v43 }
  0xf8   : > { %963 = vmatpush.msrb.mxu0 %v1576_v41  ;;  %1058 = vmatpush.msrb.mxu3 %v1570_v40 }
  0xf9   : > { %995 = vmatpush.msrb.mxu1 %v1576_v41  ;;  %1029 = vmatpush.msrb.mxu2 %v1590_v44 }
  0xfa   : > { %964 = vmatpush.msrb.mxu0 %v1583_v43  ;;  %1059 = vmatpush.msrb.mxu3 %v1576_v41 }
  0xfb   : > { %996 = vmatpush.msrb.mxu1 %v1583_v43  ;;  %1030 = vmatpush.msrb.mxu2 %v1602_v47  ;;  %v434_v53 = vpop.f32.mrf.mxu3 }
  0xfc   : > { %965 = vmatpush.msrb.mxu0 %v1590_v44  ;;  %1060 = vmatpush.msrb.mxu3 %v1583_v43  ;;  %v437_v56 = vand.u32 2147483647, %v434_v53 }
  0xfd   : > { %997 = vmatpush.msrb.mxu1 %v1590_v44  ;;  %1031 = vmatpush.msrb.mxu2 %v1609_v48 }
  0xfe   : > { %966 = vmatpush.msrb.mxu0 %v1602_v47  ;;  %1061 = vmatpush.msrb.mxu3 %v1590_v44  ;;  %v438_v59 = vsel %vm341_vm0, %v437_v56, 0.0 }
  0xff   : > { %998 = vmatpush.msrb.mxu1 %v1602_v47  ;;  %1032 = vmatpush.msrb.mxu2 %v1618_v51 }
 0x100   : > { %967 = vmatpush.msrb.mxu0 %v1609_v48  ;;  %1062 = vmatpush.msrb.mxu3 %v1602_v47 }
 0x101   : > { %999 = vmatpush.msrb.mxu1 %v1609_v48  ;;  %1033 = vmatpush.msrb.mxu2 %v1625_v52 }
 0x102   : > { %968 = vmatpush.msrb.mxu0 %v1618_v51  ;;  %v370_v21 = vpop.f32.mrf.mxu1  ;;  %v337_v26 = vpop.f32.mrf.mxu0  ;;  %1063 = vmatpush.msrb.mxu3 %v1609_v48 }
 0x103   : > { %v373_v28 = vand.u32 2147483647, %v370_v21  ;;  %v340_v31 = vand.u32 2147483647, %v337_v26  ;;  %1034 = vmatmul.f32.vlgmr.msrb.gmra.mxu2 %v1016_v15  ;;  %1000 = vmatpush.msrb.mxu1 %v1618_v51 }
 0x104   : > { %969 = vmatpush.msrb.mxu0 %v1625_v52  ;;  %1064 = vmatpush.msrb.mxu3 %v1618_v51 }
 0x105   : > { %v374_v42 = vsel %vm341_vm0, %v373_v28, 0.0  ;;  %970 = vmatmul.f32.vlgmr.msrb.gmra.mxu0 %v952_v14  ;;  %1001 = vmatpush.msrb.mxu1 %v1625_v52  ;;  %v342_v49 = vsel %vm341_vm0, %v340_v31, 0.0 }
 0x106   : > { %375 = vadd.xlane.f32.xlu1 %v374_v42  ;;  %1082 = vmatpush.msra.mxu0 %v1354_v46 }
 0x107   : > { %1065 = vmatpush.msrb.mxu3 %v1625_v52  ;;  %1002 = vmatmul.f32.vlgmr.msrb.gmra.mxu1 %v984_v39 }
 0x108   : > { %1066 = vmatmul.f32.vlgmr.msrb.gmra.mxu3 %v1048_v45  ;;  %1083 = vmatpush.msra.mxu0 %v1355_v54 }
 0x109   : > { %343 = vadd.xlane.f32.xlu0 %v342_v49  ;;  %407 = vadd.xlane.f32.xlu2 %v406_v50 }
 0x10a   : > { %1084 = vmatpush.msra.mxu0 %v1356_v55  ;;  %v498_v8 = vpop.f32.mrf.mxu1 }
 0x10b   : > { %v501_v9 = vand.u32 2147483647, %v498_v8 }
 0x10c   : > { %1085 = vmatpush.msra.mxu0 %v1357_v57  ;;  %v466_v60 = vpop.f32.mrf.mxu0 }
 0x10d   : > { %v469_v0 = vand.u32 2147483647, %v466_v60 }
 0x10e   : > { %1086 = vmatpush.msra.mxu0 %v1358_v58 }
 0x10f   : > { %v470_v6 = vsel %vm341_vm0, %v469_v0, 0.0 }
 0x110   : > { %1087 = vmatpush.msra.mxu0 %v1359_v61 }
 0x111   : > { %439 = vadd.xlane.f32.xlu0 %v438_v59 }
 0x112   : > { %v530_v62 = vpop.f32.mrf.mxu2  ;;  %1088 = vmatpush.msra.mxu0 %v1360_v63 }
 0x113   : > { %v533_v1 = vand.u32 2147483647, %v530_v62 }
 0x114   : > { %v562_v2 = vpop.f32.mrf.mxu3  ;;  %1089 = vmatpush.msra.mxu0 %v1563_v37  ;;  %v502_v37 = vsel %vm341_vm0, %v501_v9, 0.0 }
 0x115   : > { %v565_v3 = vand.u32 2147483647, %v562_v2  ;;  %v534_v4 = vsel %vm341_vm0, %v533_v1, 0.0 }
 0x116   : > { %535 = vadd.xlane.f32.xlu2 %v534_v4  ;;  %1090 = vmatpush.msra.mxu0 %v1570_v40  ;;  %v1080_v40 = vpop.permute.xlu2 %1079 }
 0x117   : > { %v566_v7 = vsel %vm341_vm0, %v565_v3, 0.0 }
 0x118   : > { %567 = vadd.xlane.f32.xlu1 %v566_v7  ;;  %1091 = vmatpush.msra.mxu0 %v1576_v41 }
 0x119   : > { %471 = vadd.xlane.f32.xlu0 %v470_v6 }
 0x11a   : > { %1092 = vmatpush.msra.mxu0 %v1583_v43 }
 0x11c   : > { %1093 = vmatpush.msra.mxu0 %v1590_v44 }
 0x11e   : > { %1094 = vmatpush.msra.mxu0 %v1602_v47 }
 0x120   : > { %1095 = vmatpush.msra.mxu0 %v1609_v48 }
 0x121   : > { %503 = vadd.xlane.f32.xlu0 %v502_v37 }
 0x122   : > { %1096 = vmatpush.msra.mxu0 %v1618_v51  ;;  %v594_v10 = vpop.f32.mrf.mxu0 }
 0x123   : > { %v597_v11 = vand.u32 2147483647, %v594_v10 }
 0x124   : > { %1097 = vmatpush.msra.mxu0 %v1625_v52  ;;  %v626_v43 = vpop.f32.mrf.mxu1 }
 0x125   : > { %1098 = vmatmul.f32.vlgmr.msra.gmra.mxu0 %v1080_v40  ;;  %v598_v41 = vsel %vm341_vm0, %v597_v11, 0.0  ;;  %v629_v44 = vand.u32 2147483647, %v626_v43  ;;  %v1402_v11 = vmov 0.0  }
 0x126   : > { %v658_v13 = vpop.f32.mrf.mxu2  ;;  %295 = vst.msk [vmem:[#allocation2] sm:$0xf] %vm294_vm1, %v1402_v11 }
 0x127   : > { %v630_v47 = vsel %vm341_vm0, %v629_v44, 0.0  ;;  %v661_v51 = vand.u32 2147483647, %v658_v13 }
 0x129   : > { %599 = vadd.xlane.f32.xlu0 %v598_v41  ;;  %v662_v17 = vsel %vm341_vm0, %v661_v51, 0.0 }
 0x12e   : > { %v690_v12 = vpop.f32.mrf.mxu3 }
 0x12f   : > { %v693_v16 = vand.u32 2147483647, %v690_v12 }
 0x131   : > { %631 = vadd.xlane.f32.xlu0 %v630_v47  ;;  %v694_v48 = vsel %vm341_vm0, %v693_v16, 0.0 }
 0x132   : > { %695 = vadd.xlane.f32.xlu1 %v694_v48 }
 0x139   : > { %663 = vadd.xlane.f32.xlu0 %v662_v17 }
 0x13e   : > { %v779_v23 = vpop.f32.mrf.mxu2 }
 0x13f   : > { %v782_v24 = vand.u32 2147483647, %v779_v23 }
 0x141   : > { %v783_v29 = vsel %vm341_vm0, %v782_v24, 0.0 }
 0x142   : > { %v715_v52 = vpop.f32.mrf.mxu0  ;;  %v747_v19 = vpop.f32.mrf.mxu1  ;;  %784 = vadd.xlane.f32.xlu1 %v783_v29 }
 0x143   : > { %v718_v20 = vand.u32 2147483647, %v715_v52  ;;  %v750_v22 = vand.u32 2147483647, %v747_v19 }
 0x144   : > { %v811_v30 = vpop.f32.mrf.mxu3 }
 0x145   : > { %v719_v25 = vsel %vm341_vm0, %v718_v20, 0.0  ;;  %v751_v27 = vsel %vm341_vm0, %v750_v22, 0.0  ;;  %v814_v32 = vand.u32 2147483647, %v811_v30 }
 0x146   : > { %720 = vadd.xlane.f32.xlu2 %v719_v25  ;;  %752 = vadd.xlane.f32.xlu0 %v751_v27  ;;  %v1403_v27 = vmov 0  }
 0x147   : > { %v815_v33 = vsel %vm341_vm0, %v814_v32, 0.0  ;;  %1327 = vset.pattern.permute.xlu0 %v1403_v27 }
 0x14e   : > { %816 = vadd.xlane.f32.xlu2 %v815_v33 }
 0x162   : > { %v843_v5 = vpop.f32.mrf.mxu0  ;;  %v875_v35 = vpop.f32.mrf.mxu1 }
 0x163   : > { %v846_v34 = vand.u32 2147483647, %v843_v5  ;;  %v878_v14 = vand.u32 2147483647, %v875_v35  ;;  %v907_v15 = vpop.f32.mrf.mxu2 }
 0x164   : > { %v910_v18 = vand.u32 2147483647, %v907_v15 }
 0x165   : > { %v847_v36 = vsel %vm341_vm0, %v846_v34, 0.0  ;;  %v879_v21 = vsel %vm341_vm0, %v878_v14, 0.0 }
 0x166   : > { %848 = vadd.xlane.f32.xlu0 %v847_v36  ;;  %880 = vadd.xlane.f32.xlu1 %v879_v21  ;;  %v911_v26 = vsel %vm341_vm0, %v910_v18, 0.0 }
 0x167   : > { %912 = vadd.xlane.f32.xlu2 %v911_v26 }
 0x169   : > { %v939_v28 = vpop.f32.mrf.mxu3 }
 0x16a   : > { %v942_v31 = vand.u32 2147483647, %v939_v28 }
 0x16c   : > { %v943_v38 = vsel %vm341_vm0, %v942_v31, 0.0 }
 0x16e   : > { %944 = vadd.xlane.f32.xlu0 %v943_v38 }
 0x179   : > { %v376_v2 = vpop.xlane.xlu1 %375 }
 0x17c   : > { %v344_v62 = vpop.xlane.xlu0 %343  ;;  %v408_v4 = vpop.xlane.xlu2 %407 }
 0x17d   : > { %v377_v3 = vadd.f32 %v376_v2, %v344_v62 }
 0x17f   : > { %v409_v7 = vadd.f32 %v408_v4, %v377_v3 }
 0x182   : > { %v971_v39 = vpop.f32.mrf.mxu0 }
 0x183   : > { %v974_v42 = vand.u32 2147483647, %v971_v39  ;;  %v1107_v39 = vld [vmem:[#allocation2] sm:$0xf] }
 0x184   : > { %v1003_v45 = vpop.f32.mrf.mxu1  ;;  %v440_v63 = vpop.xlane.xlu0 %439 }
 0x185   : > { %v1006_v46 = vand.u32 2147483647, %v1003_v45  ;;  %v975_v49 = vsel %vm341_vm0, %v974_v42, 0.0  ;;  %v441_v8 = vadd.f32 %v440_v63, %v409_v7  ;;  %v1361_v63 = vld [vmem:[%s1462_s29] sm:$0xf] }
 0x186   : > { %v1035_v50 = vpop.f32.mrf.mxu2  ;;  %976 = vadd.xlane.f32.xlu1 %v975_v49  ;;  %v1115_v49 = vld [vmem:[%s282_s5] sm:$0xf] }
 0x187   : > { %v1038_v53 = vand.u32 2147483647, %v1035_v50  ;;  %v1007_v54 = vsel %vm341_vm0, %v1006_v46, 0.0 }
 0x188   : > { %1008 = vadd.xlane.f32.xlu2 %v1007_v54 }
 0x189   : > { %v1039_v55 = vsel %vm341_vm0, %v1038_v53, 0.0  ;;  %v536_v40 = vpop.xlane.xlu2 %535 }
 0x18a   : > { %1040 = vadd.xlane.f32.xlu0 %v1039_v55 }
 0x18b   : > { %v1067_v56 = vpop.f32.mrf.mxu3  ;;  %v568_v43 = vpop.xlane.xlu1 %567 }
 0x18c   : > { %v1070_v57 = vand.u32 2147483647, %v1067_v56  ;;  %v472_v0 = vpop.xlane.xlu0 %471 }
 0x18d   : > { %v473_v9 = vadd.f32 %v472_v0, %v441_v8 }
 0x18e   : > { %v1071_v58 = vsel %vm341_vm0, %v1070_v57, 0.0 }
 0x18f   : > { %1072 = vadd.xlane.f32.xlu1 %v1071_v58 }
 0x194   : > { %v504_v1 = vpop.xlane.xlu0 %503 }
 0x195   : > { %v505_v37 = vadd.f32 %v504_v1, %v473_v9 }
 0x197   : > { %v537_v41 = vadd.f32 %v536_v40, %v505_v37 }
 0x199   : > { %v569_v44 = vadd.f32 %v568_v43, %v537_v41 }
 0x19c   : > { %v600_v6 = vpop.xlane.xlu0 %599 }
 0x19d   : > { %v601_v47 = vadd.f32 %v600_v6, %v569_v44 }
 0x1a2   : > { %v1099_v59 = vpop.f32.mrf.mxu0 }
 0x1a3   : > { %v1102_v60 = vand.u32 2147483647, %v1099_v59 }
 0x1a4   : > { %v632_v10 = vpop.xlane.xlu0 %631 }
 0x1a5   : > { %v1103_v61 = vsel %vm341_vm0, %v1102_v60, 0.0  ;;  %v633_v13 = vadd.f32 %v632_v10, %v601_v47  ;;  %v696_v48 = vpop.xlane.xlu1 %695 }
 0x1a6   : > { %1104 = vadd.xlane.f32.xlu2 %v1103_v61 }
 0x1ac   : > { %v664_v12 = vpop.xlane.xlu0 %663 }
 0x1ad   : > { %v665_v16 = vadd.f32 %v664_v12, %v633_v13 }
 0x1af   : > { %v697_v17 = vadd.f32 %v696_v48, %v665_v16 }
 0x1b5   : > { %v785_v22 = vpop.xlane.xlu1 %784 }
 0x1b9   : > { %v721_v51 = vpop.xlane.xlu2 %720  ;;  %v753_v19 = vpop.xlane.xlu0 %752 }
 0x1ba   : > { %v722_v52 = vadd.f32 %v721_v51, %v697_v17 }
 0x1bc   : > { %v754_v20 = vadd.f32 %v753_v19, %v722_v52 }
 0x1be   : > { %v786_v24 = vadd.f32 %v785_v22, %v754_v20 }
 0x1c1   : > { %v817_v23 = vpop.xlane.xlu2 %816 }
 0x1c2   : > { %v818_v29 = vadd.f32 %v817_v23, %v786_v24 }
 0x1d9   : > { %v849_v25 = vpop.xlane.xlu0 %848  ;;  %v881_v32 = vpop.xlane.xlu1 %880 }
 0x1da   : > { %v850_v30 = vadd.f32 %v849_v25, %v818_v29  ;;  %v913_v5 = vpop.xlane.xlu2 %912 }
 0x1dc   : > { %v882_v33 = vadd.f32 %v881_v32, %v850_v30 }
 0x1de   : > { %v914_v35 = vadd.f32 %v913_v5, %v882_v33 }
 0x1e1   : > { %v945_v34 = vpop.xlane.xlu0 %944 }
 0x1e2   : > { %v946_v14 = vadd.f32 %v945_v34, %v914_v35 }
 0x1f9   : > { %v977_v36 = vpop.xlane.xlu1 %976 }
 0x1fa   : > { %v978_v15 = vadd.f32 %v977_v36, %v946_v14 }
 0x1fb   : > { %v1009_v18 = vpop.xlane.xlu2 %1008 }
 0x1fc   : > { %v1010_v21 = vadd.f32 %v1009_v18, %v978_v15 }
 0x1fd   : > { %v1041_v26 = vpop.xlane.xlu0 %1040 }
 0x1fe   : > { %v1042_v31 = vadd.f32 %v1041_v26, %v1010_v21 }
 0x202   : > { %v1073_v28 = vpop.xlane.xlu1 %1072 }
 0x203   : > { %v1074_v38 = vadd.f32 %v1073_v28, %v1042_v31 }
 0x219   : > { %v1105_v42 = vpop.xlane.xlu2 %1104 }
 0x21a   : > { %v1106_v45 = vadd.f32 %v1105_v42, %v1074_v38 }
 0x21c   : > { %v1108_v46 = vadd.f32 %v1107_v39, %v1106_v45 }
 0x21e   : > { %1110 = vst.msk [vmem:[#allocation2] sm:$0xf] %vm294_vm1, %v1108_v46 }
 0x225   : > { %v1114_v50 = vld [vmem:[#allocation2] sm:$0xf] }
 0x226   : > { %v1116_v53 = vmul.f32 %v1115_v49, %v1114_v50 }
 0x228   : > { %1352 = vrsqrt.f32 %v1116_v53  ;;  %vm1124_vm3 = vweird.f32 %v1116_v53  ;;  %vm1117_vm5 = vcmp.gt.f32.partialorder %v1116_v53, 0.0 }
 0x22e   : > { %v1353_v54 = vpop.eup %1352 }
 0x22f   : > { %v1119_v55 = vmul.f32 %v1353_v54, %v1116_v53  ;;  %vm1125_vm2 = vweird.f32 %v1353_v54 }
 0x230   : > { %vm1126_vm4 = vmor %vm1124_vm3, %vm1125_vm2 }
 0x231   : > { %v1120_v56 = vmul.f32 %v1353_v54, %v1119_v55 }
 0x233   : > { %v1121_v57 = vmul.f32 0.5, %v1120_v56 }
 0x235   : > { %v1122_v58 = vsub.f32 1.5, %v1121_v57 }
 0x237   : > { %v1123_v59 = vmul.f32 %v1353_v54, %v1122_v58 }
 0x239   : > { %v1127_v60 = vsel %vm1126_vm4, %v1353_v54, %v1123_v59 }
 0x23a   : > { %v1128_v61 = vsel %vm1117_vm5, %v1127_v60, 0.0 }
 0x23b   : > { %1131 = vperm.xlu0 %1327, %v1128_v61  }
 0x2ad   : > { %v1132_v62 = vpop.permute.xlu0 %1131 }
 0x2ae   : > { %v1134_v0 = vmul.f32 %v1361_v63, %v1132_v62 }
 0x2b0   : > { %1136 = vst.msk [vmem:[%s289_s8] sm:$0xf] %vm1135_vm6, %v1134_v0 }
 0x2b1 PF: > { %s14_s17 = sadd.s32 1, %s1384_s17   ;;  %s2064_s15 = smov %s1380_s16 }
 0x2b2   : > { %p11_p5 = scmp.ge.s32.totalorder %s14_s17, 4   ;;  %s2065_s16 = smov %s2067_s18 }
 0x2b4   :  { %13 = sbr.rel (!%p11_p5) target bundleno = 2 (0x2), region = 80 }

</bundles_post_ra>
